<compile_context>
chip_gen: v6e
topology: v6e:2x2x1
jax: 0.10.0
libtpu: 0.0.40
codegen_flags: <defaults>
</compile_context>

<pallas_src>
import functools
import math

import jax
import jax.numpy as jnp
from jax.experimental import pallas as pl
from jax.experimental.pallas import tpu as pltpu


def _fused_blocks_kernel(
    x_ref, y_ref,
    wk_ref, wv_ref, wo_ref, w1_ref, w2_ref, vecs_ref, b1_ref,
    out_ref, attn_ref,
    *, n_heads, n_blocks,
):
    # x_ref / y_ref: (Bt, S, D) batch tile (f32)
    # wk/wv/wo: (N, D, D) bf16 pre-transposed (in, out); w1: (N, D, DFF); w2: (N, DFF, D)
    # vecs: (N, 8, D) f32  rows: 0=bk, 1=bv, 2=bo, 3=ln1_g, 4=ln1_b, 5=b2, 6=ln2_g, 7=ln2_b
    # b1:   (N, 1, DFF) f32
    # out_ref: (Bt, S, D) f32
    # attn_ref: (Bt, H*S, S) f32  (last block's pre-zero_pad softmax, head-major rows)
    Bt, S, D = x_ref.shape
    H = n_heads
    dk = D // H
    R = Bt * S
    f32 = jnp.float32
    bf16 = jnp.bfloat16
    inv_sqrt_dk = 1.0 / math.sqrt(dk)

    # Flatten (Bt, S, D) -> (Bt*S, D): layout preserving (last dim untouched), so the
    # projections / out_proj / FFN feed the MXU with Bt*S-row LHS tiles.
    x = x_ref[...].reshape(R, D)
    y = y_ref[...].reshape(R, D)
    yb = y.astype(bf16)                                  # value stream, cast once

    # Masks built once, reused by every block / head.
    row = jax.lax.broadcasted_iota(jnp.int32, (S, S), 0)
    col = jax.lax.broadcasted_iota(jnp.int32, (S, S), 1)
    # mask==0 path: allowed iff key index strictly precedes the query index.
    allowed = (col < row)[None, :, :]                    # (1, S, S)
    # zero_pad=True: attention weights of query row 0 are replaced with zeros.
    not_first = (row > 0).astype(f32)[None, :, :]        # (1, S, S)

    h = x                                                # residual stream, f32 (R, D)
    # TODO(synk): for n_blocks > ~4 switch this static Python loop to lax.fori_loop with
    # dynamic ref[n] indexing to bound live ranges / unrolled code size.
    for n in range(n_blocks):
        vec = vecs_ref[n]                                # (8, D) f32
        bk, bv, bo = vec[0:1, :], vec[1:2, :], vec[2:3, :]
        g1, be1 = vec[3:4, :], vec[4:5, :]
        b2 = vec[5:6, :]
        g2, be2 = vec[6:7, :], vec[7:8, :]
        wo_n = wo_ref[n]                                 # (D, D) bf16, (in, out)

        # ---- MultiHeadAttention: K/V projections --------------------------------
        # kq_same=1 and query input == key input  =>  q == k bit-exactly; the Q
        # projection is deduplicated (one (R,D)x(D,D) MXU matmul saved per block).
        hb = h.astype(bf16)
        k = jnp.dot(hb, wk_ref[n], preferred_element_type=f32) + bk     # (R, D)
        v = jnp.dot(yb, wv_ref[n], preferred_element_type=f32) + bv     # (R, D)
        kb = k.astype(bf16)
        vb = v.astype(bf16)

        # ---- attention(): per-head, batched over the Bt tile --------------------
        # concat-heads + out_proj is fused into a per-head accumulation, so no
        # (R, D) concat is ever materialized.
        attn_out = jnp.zeros((R, D), f32)
        for hd in range(H):
            sl = slice(hd * dk, (hd + 1) * dk)
            kh = kb[:, sl].reshape(Bt, S, dk)            # (Bt, S, dk), q == k
            vh = vb[:, sl].reshape(Bt, S, dk)

            s = jnp.einsum('bqe,bke->bqk', kh, kh,
                           preferred_element_type=f32) * inv_sqrt_dk
            s = jnp.where(allowed, s, jnp.float32(-1e32))
            m = jnp.max(s, axis=-1, keepdims=True)
            e = jnp.exp(s - m)
            denom = jnp.sum(e, axis=-1, keepdims=True)
            if n == n_blocks - 1:
                # Architecture.forward only keeps the last block's attention weights;
                # emb_type=='qid' returns the PRE-zero_pad softmax.  Exact division so
                # the stored rows sum to 1 (approx reciprocal kept off the stored path).
                p = e / denom
                attn_ref[:, hd * S:(hd + 1) * S, :] = p
            else:
                p = e * pl.reciprocal(denom, approx=True)     # EUP slot, o-path only
            # Row 0 has no allowed keys -> uniform 1/S row, matching the reference.

            p_zp = (p * not_first).astype(bf16)          # zero_pad: query row 0 -> 0
            o = jnp.einsum('bqk,bke->bqe', p_zp, vh,
                           preferred_element_type=f32)   # (Bt, S, dk)
            # fused "concat + out_proj": accumulate  o_h @ Wo^T[h*dk:(h+1)*dk, :]
            attn_out = attn_out + jnp.dot(o.reshape(R, dk).astype(bf16),
                                          wo_n[sl, :], preferred_element_type=f32)
        attn_out = attn_out + bo

        # ---- residual + LayerNorm1 (dropout1 == identity in eval) ---------------
        h1 = h + attn_out
        mu = jnp.mean(h1, axis=-1, keepdims=True)
        var = jnp.mean((h1 - mu) ** 2, axis=-1, keepdims=True)
        h1 = (h1 - mu) * jax.lax.rsqrt(var + 1e-5) * g1 + be1

        # ---- position-wise FFN (ReLU), bf16 matmuls with f32 accumulation -------
        f = jnp.dot(h1.astype(bf16), w1_ref[n], preferred_element_type=f32) + b1_ref[n]
        f = jnp.maximum(f, 0.0)
        f2 = jnp.dot(f.astype(bf16), w2_ref[n], preferred_element_type=f32) + b2

        # ---- residual + LayerNorm2 (dropout2 == identity in eval) ---------------
        h2 = h1 + f2
        mu2 = jnp.mean(h2, axis=-1, keepdims=True)
        var2 = jnp.mean((h2 - mu2) ** 2, axis=-1, keepdims=True)
        h = (h2 - mu2) * jax.lax.rsqrt(var2 + 1e-5) * g2 + be2

    out_ref[...] = h.reshape(Bt, S, D).astype(out_ref.dtype)


def _pick_batch_tile(batch, seqlen, target_rows=256):
    """Smallest divisor Bt of `batch` with Bt*seqlen >= target_rows (fills the MXU and
    amortizes per-grid-step overhead); falls back to the whole batch."""
    for bt in range(1, batch + 1):
        if batch % bt == 0 and bt * seqlen >= target_rows:
            return bt
    return batch


def architecture_forward(params, pe, q_embed_data, qa_embed_data, n_heads,
                         batch_tile=None):
    """Add cosine positional embedding, then run all fused transformer blocks
    (query = key = question stream, values = interaction stream) in ONE pallas_call."""
    B, S, D = q_embed_data.shape
    N, _, DFF = params['w1'].shape
    H = n_heads

    x = q_embed_data + pe[None, :S, :]
    y = qa_embed_data + pe[None, :S, :]

    Bt = _pick_batch_tile(B, S) if batch_tile is None else batch_tile
    assert B % Bt == 0, "batch tile must divide batch"
    grid = (B // Bt,)

    kernel = functools.partial(_fused_blocks_kernel, n_heads=H, n_blocks=N)

    def wspec(shape):
        # Weights: same block every grid step -> stays resident in VMEM, no re-DMA.
        # TODO(synk): on v7x at production D/DFF/n_blocks, add pipeline_mode=pl.Buffered(1)
        # here (or stream blocks via an inner 'arbitrary' grid axis) to cut residency.
        return pl.BlockSpec(shape, lambda b: (0,) * len(shape))

    # Advisory cost estimate for XLA scheduling around the custom call.
    flops = 2 * B * S * N * (2 * D * D           # k, v projections
                             + 2 * S * D         # QK^T + PV (summed over heads)
                             + D * D             # out_proj
                             + 2 * D * DFF)      # FFN
    transcendentals = B * N * H * S * S          # softmax exp
    bytes_accessed = (4 * (3 * B * S * D + B * H * S * S)
                      + 2 * N * (3 * D * D + 2 * D * DFF)
                      + 4 * N * (8 * D + DFF))
    cost = pl.CostEstimate(flops=flops, transcendentals=transcendentals,
                           bytes_accessed=bytes_accessed)

    # VMEM budget: double-buffered blocks + headroom for in-kernel temporaries.
    block_bytes = (2 * N * (3 * D * D + 2 * D * DFF)           # bf16 weight stack
                   + 4 * N * (8 * D + DFF)                     # f32 bias / LN vectors
                   + 4 * (3 * Bt * S * D + Bt * H * S * S))    # x, y, out, attn tiles
    vmem_limit = int(min(max(2 * block_bytes + (16 << 20), 32 << 20), 112 << 20))

    out, attn_flat = pl.pallas_call(
        kernel,
        grid=grid,                              # batch tiles; 'parallel' -> 2 TCs on v7x
        in_specs=[
            pl.BlockSpec((Bt, S, D), lambda b: (b, 0, 0)),     # x (question stream)
            pl.BlockSpec((Bt, S, D), lambda b: (b, 0, 0)),     # y (interaction stream)
            wspec((N, D, D)),                                  # wk^T (== wq, kq_same=1)
            wspec((N, D, D)),                                  # wv^T
            wspec((N, D, D)),                                  # wo^T
            wspec((N, D, DFF)),                                # w1^T
            wspec((N, DFF, D)),                                # w2^T
            wspec((N, 8, D)),                                  # consolidated bias/LN vecs
            wspec((N, 1, DFF)),                                # b1
        ],
        out_specs=(
            pl.BlockSpec((Bt, S, D), lambda b: (b, 0, 0)),
            pl.BlockSpec((Bt, H * S, S), lambda b: (b, 0, 0)),
        ),
        out_shape=(jax.ShapeDtypeStruct((B, S, D), jnp.float32),
                   jax.ShapeDtypeStruct((B, H * S, S), jnp.float32)),
        compiler_params=pltpu.CompilerParams(
            dimension_semantics=("parallel",),
            vmem_limit_bytes=vmem_limit),
        cost_estimate=cost,
    )(x, y, params['wk'], params['wv'], params['wo'],
      params['w1'], params['w2'], params['vecs'], params['b1'])

    # (B, H*S, S) -> (B, H, S, S): metadata-only reshape outside the kernel.
    # TODO(synk): for production S (~200) pad the key axis to a multiple of 128 so the
    # attention-weight stores are lane-dense, and add a flag to skip this output when
    # the caller does not consume attn_weights.
    attn = attn_flat.reshape(B, H, S, S)
    return out, attn


def make_positional_embedding(d_model, max_len):
    # CosinePositionalEmbedding: for even d_model the random init is fully overwritten
    # by the interleaved sin/cos table, so it is deterministic.
    position = jnp.arange(max_len, dtype=jnp.float32)[:, None]
    div_term = jnp.exp(jnp.arange(0, d_model, 2, dtype=jnp.float32)
                       * (-math.log(10000.0) / d_model))
    ang = position * div_term                            # (max_len, d_model // 2)
    pe = jnp.stack([jnp.sin(ang), jnp.cos(ang)], axis=-1).reshape(max_len, d_model)
    return pe


def init_params(key, n_blocks, d_model, d_ff):
    """Per-block weights stacked on a leading n_blocks axis (kq_same=1 -> no wq).

    Linear weights are generated in the PyTorch nn.Linear convention
    (out_features, in_features), then stored PRE-TRANSPOSED to (in, out) and cast to
    bfloat16 so the kernel's contractions are plain `x @ w` MXU matmuls."""
    def xavier(k, shape):
        fan_out, fan_in = shape
        limit = math.sqrt(6.0 / (fan_in + fan_out))
        return jax.random.uniform(k, shape, jnp.float32, -limit, limit)

    wk, wv, wo, w1, w2, vecs, b1 = [], [], [], [], [], [], []
    for blk in range(n_blocks):
        ks = jax.random.split(jax.random.fold_in(key, blk), 7)
        wk.append(xavier(ks[0], (d_model, d_model)).T)
        wv.append(xavier(ks[1], (d_model, d_model)).T)
        wo.append(xavier(ks[2], (d_model, d_model)).T)
        w1.append(xavier(ks[3], (d_ff, d_model)).T)
        w2.append(xavier(ks[4], (d_model, d_ff)).T)
        # consolidated per-channel vectors: [bk, bv, bo, ln1_g, ln1_b, b2, ln2_g, ln2_b]
        v = jnp.zeros((8, d_model), jnp.float32)
        v = v.at[3].set(1.0).at[6].set(1.0)              # LayerNorm gammas
        v = v.at[5].set(0.01 * jax.random.normal(ks[5], (d_model,), jnp.float32))  # b2
        vecs.append(v)
        b1.append(0.01 * jax.random.normal(ks[6], (1, d_ff), jnp.float32))

    bf16 = jnp.bfloat16
    return dict(
        wk=jnp.stack(wk).astype(bf16), wv=jnp.stack(wv).astype(bf16),
        wo=jnp.stack(wo).astype(bf16),
        w1=jnp.stack(w1).astype(bf16), w2=jnp.stack(w2).astype(bf16),
        vecs=jnp.stack(vecs), b1=jnp.stack(b1),
    )


if __name__ == "__main__":
    # small shapes consistent with the module: n_heads * d_feature = d_model
    B, S, D, H, DFF, NBLOCKS, SEQ_LEN = 2, 8, 32, 2, 64, 2, 16

    key = jax.random.PRNGKey(0)
    k1, k2, k3 = jax.random.split(key, 3)
    q_embed_data = jax.random.normal(k1, (B, S, D), jnp.float32)
    qa_embed_data = jax.random.normal(k2, (B, S, D), jnp.float32)

    params = init_params(k3, NBLOCKS, D, DFF)
    pe = make_positional_embedding(D, SEQ_LEN)

    x, attn_weights = architecture_forward(params, pe, q_embed_data, qa_embed_data, H)
    jax.block_until_ready((x, attn_weights))

    assert x.shape == (B, S, D)
    assert attn_weights.shape == (B, H, S, S)
    assert bool(jnp.all(jnp.isfinite(x)))
    assert bool(jnp.all(jnp.isfinite(attn_weights)))
    # returned attention weights are an exact softmax -> every row sums to ~1
    row_sums = jnp.sum(attn_weights, axis=-1)
    assert bool(jnp.all(jnp.abs(row_sums - 1.0) < 1e-3))
    # TODO(synk): dropout layers are treated as identity (eval mode); the emb_type=='qid'
    # sub_scores sort/cumsum diagnostic and the 'sparseattn'/'accumulative' pruning
    # branches in attention() do not affect the returned tensors and are omitted.
    print("KERNEL_OK")
</pallas_src>

<mosaic_0001>
module attributes {stable_mosaic.version = 11 : i64} {
  func.func @_fused_blocks_kernel(%arg0: i32, %arg1: memref<2x8x32xf32, #tpu.memory_space<vmem>>, %arg2: memref<2x8x32xf32, #tpu.memory_space<vmem>>, %arg3: memref<2x32x32xbf16, #tpu.memory_space<vmem>>, %arg4: memref<2x32x32xbf16, #tpu.memory_space<vmem>>, %arg5: memref<2x32x32xbf16, #tpu.memory_space<vmem>>, %arg6: memref<2x32x64xbf16, #tpu.memory_space<vmem>>, %arg7: memref<2x64x32xbf16, #tpu.memory_space<vmem>>, %arg8: memref<2x8x32xf32, #tpu.memory_space<vmem>>, %arg9: memref<2x1x64xf32, #tpu.memory_space<vmem>>, %arg10: memref<2x8x32xf32, #tpu.memory_space<vmem>>, %arg11: memref<2x16x8xf32, #tpu.memory_space<vmem>>) attributes {dimension_semantics = [#tpu.dimension_semantics<parallel>], iteration_bounds = array<i64: 1>, scalar_prefetch = 0 : i64, scratch_operands = 0 : i64, tpu.core_type = #tpu.core_type<tc>, window_params = [{transform_indices = @transform_0, window_bounds = array<i64: 2, 8, 32>}, {transform_indices = @transform_1, window_bounds = array<i64: 2, 8, 32>}, {pipeline_mode = #tpu.pipeline_mode<synchronous>, transform_indices = @transform_2, window_bounds = array<i64: 2, 32, 32>}, {pipeline_mode = #tpu.pipeline_mode<synchronous>, transform_indices = @transform_3, window_bounds = array<i64: 2, 32, 32>}, {pipeline_mode = #tpu.pipeline_mode<synchronous>, transform_indices = @transform_4, window_bounds = array<i64: 2, 32, 32>}, {pipeline_mode = #tpu.pipeline_mode<synchronous>, transform_indices = @transform_5, window_bounds = array<i64: 2, 32, 64>}, {pipeline_mode = #tpu.pipeline_mode<synchronous>, transform_indices = @transform_6, window_bounds = array<i64: 2, 64, 32>}, {pipeline_mode = #tpu.pipeline_mode<synchronous>, transform_indices = @transform_7, window_bounds = array<i64: 2, 8, 32>}, {pipeline_mode = #tpu.pipeline_mode<synchronous>, transform_indices = @transform_8, window_bounds = array<i64: 2, 1, 64>}, {transform_indices = @transform_9, window_bounds = array<i64: 2, 8, 32>}, {transform_indices = @transform_10, window_bounds = array<i64: 2, 16, 8>}]} {
    %c0 = arith.constant 0 : index
    %c0_0 = arith.constant 0 : index
    %c0_1 = arith.constant 0 : index
    %0 = vector.load %arg1[%c0, %c0_0, %c0_1] : memref<2x8x32xf32, #tpu.memory_space<vmem>>, vector<2x8x32xf32>
    %1 = vector.shape_cast %0 : vector<2x8x32xf32> to vector<16x32xf32>
    %c0_2 = arith.constant 0 : index
    %c0_3 = arith.constant 0 : index
    %c0_4 = arith.constant 0 : index
    %2 = vector.load %arg2[%c0_2, %c0_3, %c0_4] : memref<2x8x32xf32, #tpu.memory_space<vmem>>, vector<2x8x32xf32>
    %3 = vector.shape_cast %2 : vector<2x8x32xf32> to vector<16x32xf32>
    %4 = arith.truncf %3 : vector<16x32xf32> to vector<16x32xbf16>
    %5 = tpu.iota {dimensions = array<i32: 0>} : vector<8x8xi32>
    %6 = tpu.iota {dimensions = array<i32: 1>} : vector<8x8xi32>
    %7 = arith.cmpi slt, %6, %5 : vector<8x8xi32>
    %8 = vector.shape_cast %7 : vector<8x8xi1> to vector<1x8x8xi1>
    %c0_i32 = arith.constant 0 : i32
    %9 = vector.broadcast %c0_i32 : i32 to vector<8x8xi32>
    %10 = arith.cmpi sgt, %5, %9 : vector<8x8xi32>
    %11 = arith.extui %10 : vector<8x8xi1> to vector<8x8xi32>
    %12 = arith.sitofp %11 : vector<8x8xi32> to vector<8x8xf32>
    %13 = vector.shape_cast %12 : vector<8x8xf32> to vector<1x8x8xf32>
    %c0_5 = arith.constant 0 : index
    %c0_6 = arith.constant 0 : index
    %c0_7 = arith.constant 0 : index
    %14 = vector.load %arg8[%c0_5, %c0_6, %c0_7] : memref<2x8x32xf32, #tpu.memory_space<vmem>>, vector<1x8x32xf32>
    %15 = vector.shape_cast %14 : vector<1x8x32xf32> to vector<8x32xf32>
    %16 = vector.extract_strided_slice %15 {offsets = [0, 0], sizes = [1, 32], strides = [1, 1]} : vector<8x32xf32> to vector<1x32xf32>
    %17 = vector.extract_strided_slice %15 {offsets = [1, 0], sizes = [1, 32], strides = [1, 1]} : vector<8x32xf32> to vector<1x32xf32>
    %18 = vector.extract_strided_slice %15 {offsets = [2, 0], sizes = [1, 32], strides = [1, 1]} : vector<8x32xf32> to vector<1x32xf32>
    %19 = vector.extract_strided_slice %15 {offsets = [3, 0], sizes = [1, 32], strides = [1, 1]} : vector<8x32xf32> to vector<1x32xf32>
    %20 = vector.extract_strided_slice %15 {offsets = [4, 0], sizes = [1, 32], strides = [1, 1]} : vector<8x32xf32> to vector<1x32xf32>
    %21 = vector.extract_strided_slice %15 {offsets = [5, 0], sizes = [1, 32], strides = [1, 1]} : vector<8x32xf32> to vector<1x32xf32>
    %22 = vector.extract_strided_slice %15 {offsets = [6, 0], sizes = [1, 32], strides = [1, 1]} : vector<8x32xf32> to vector<1x32xf32>
    %23 = vector.extract_strided_slice %15 {offsets = [7, 0], sizes = [1, 32], strides = [1, 1]} : vector<8x32xf32> to vector<1x32xf32>
    %c0_8 = arith.constant 0 : index
    %c0_9 = arith.constant 0 : index
    %c0_10 = arith.constant 0 : index
    %24 = vector.load %arg5[%c0_8, %c0_9, %c0_10] : memref<2x32x32xbf16, #tpu.memory_space<vmem>>, vector<1x32x32xbf16>
    %25 = vector.shape_cast %24 : vector<1x32x32xbf16> to vector<32x32xbf16>
    %26 = arith.truncf %1 : vector<16x32xf32> to vector<16x32xbf16>
    %c0_11 = arith.constant 0 : index
    %c0_12 = arith.constant 0 : index
    %c0_13 = arith.constant 0 : index
    %27 = vector.load %arg3[%c0_11, %c0_12, %c0_13] : memref<2x32x32xbf16, #tpu.memory_space<vmem>>, vector<1x32x32xbf16>
    %28 = vector.shape_cast %27 : vector<1x32x32xbf16> to vector<32x32xbf16>
    %cst = arith.constant dense<0.000000e+00> : vector<16x32xf32>
    %29 = tpu.matmul %26, %28, %cst {dimension_numbers = #tpu.dot_dimension_numbers<[1], [0], [0], [1], [0, 0, 1, 1], [], []>} : vector<16x32xbf16>, vector<32x32xbf16>, vector<16x32xf32> -> vector<16x32xf32>
    %30 = vector.broadcast %16 : vector<1x32xf32> to vector<16x32xf32>
    %31 = arith.addf %29, %30 : vector<16x32xf32>
    %c0_14 = arith.constant 0 : index
    %c0_15 = arith.constant 0 : index
    %c0_16 = arith.constant 0 : index
    %32 = vector.load %arg4[%c0_14, %c0_15, %c0_16] : memref<2x32x32xbf16, #tpu.memory_space<vmem>>, vector<1x32x32xbf16>
    %33 = vector.shape_cast %32 : vector<1x32x32xbf16> to vector<32x32xbf16>
    %cst_17 = arith.constant dense<0.000000e+00> : vector<16x32xf32>
    %34 = tpu.matmul %4, %33, %cst_17 {dimension_numbers = #tpu.dot_dimension_numbers<[1], [0], [0], [1], [0, 0, 1, 1], [], []>} : vector<16x32xbf16>, vector<32x32xbf16>, vector<16x32xf32> -> vector<16x32xf32>
    %35 = vector.broadcast %17 : vector<1x32xf32> to vector<16x32xf32>
    %36 = arith.addf %34, %35 : vector<16x32xf32>
    %37 = arith.truncf %31 : vector<16x32xf32> to vector<16x32xbf16>
    %38 = arith.truncf %36 : vector<16x32xf32> to vector<16x32xbf16>
    %cst_18 = arith.constant 0.000000e+00 : f32
    %39 = vector.broadcast %cst_18 : f32 to vector<16x32xf32>
    %40 = vector.extract_strided_slice %37 {offsets = [0, 0], sizes = [16, 16], strides = [1, 1]} : vector<16x32xbf16> to vector<16x16xbf16>
    %41 = vector.shape_cast %40 : vector<16x16xbf16> to vector<2x8x16xbf16>
    %42 = vector.extract_strided_slice %38 {offsets = [0, 0], sizes = [16, 16], strides = [1, 1]} : vector<16x32xbf16> to vector<16x16xbf16>
    %43 = vector.shape_cast %42 : vector<16x16xbf16> to vector<2x8x16xbf16>
    "tpu.trace_start"() <{level = 10 : i32, message = "bqe,bke->bqk"}> : () -> ()
    %cst_19 = arith.constant dense<0.000000e+00> : vector<2x8x8xf32>
    %44 = tpu.matmul %41, %41, %cst_19 {dimension_numbers = #tpu.dot_dimension_numbers<[2], [2], [1], [1], [0, 0, 0, 1, 1, 1], [0], [0]>} : vector<2x8x16xbf16>, vector<2x8x16xbf16>, vector<2x8x8xf32> -> vector<2x8x8xf32>
    "tpu.trace_stop"() : () -> ()
    %cst_20 = arith.constant 2.500000e-01 : f32
    %45 = vector.broadcast %cst_20 : f32 to vector<2x8x8xf32>
    %46 = arith.mulf %44, %45 : vector<2x8x8xf32>
    %cst_21 = arith.constant -1.000000e+32 : f32
    %47 = vector.shape_cast %8 : vector<1x8x8xi1> to vector<1x8x8xi1>
    %48 = vector.broadcast %47 : vector<1x8x8xi1> to vector<2x8x8xi1>
    %49 = vector.broadcast %cst_21 : f32 to vector<2x8x8xf32>
    %50 = arith.select %48, %46, %49 : vector<2x8x8xi1>, vector<2x8x8xf32>
    %cst_22 = arith.constant dense<0xFF800000> : vector<2x8xf32>
    %51 = vector.multi_reduction <maximumf>, %50, %cst_22 [2] : vector<2x8x8xf32> to vector<2x8xf32>
    %52 = vector.shape_cast %51 : vector<2x8xf32> to vector<2x8x1xf32>
    %53 = vector.broadcast %52 : vector<2x8x1xf32> to vector<2x8x8xf32>
    %54 = arith.subf %50, %53 : vector<2x8x8xf32>
    %55 = math.exp %54 : vector<2x8x8xf32>
    %cst_23 = arith.constant dense<0.000000e+00> : vector<2x8xf32>
    %56 = vector.multi_reduction <add>, %55, %cst_23 [2] : vector<2x8x8xf32> to vector<2x8xf32>
    %57 = vector.shape_cast %56 : vector<2x8xf32> to vector<2x8x1xf32>
    %58 = tpu.reciprocal %57 {approx = true} : vector<2x8x1xf32> -> vector<2x8x1xf32>
    %59 = vector.broadcast %58 : vector<2x8x1xf32> to vector<2x8x8xf32>
    %60 = arith.mulf %55, %59 : vector<2x8x8xf32>
    %61 = vector.broadcast %13 : vector<1x8x8xf32> to vector<2x8x8xf32>
    %62 = arith.mulf %60, %61 : vector<2x8x8xf32>
    %63 = arith.truncf %62 : vector<2x8x8xf32> to vector<2x8x8xbf16>
    "tpu.trace_start"() <{level = 10 : i32, message = "bqk,bke->bqe"}> : () -> ()
    %cst_24 = arith.constant dense<0.000000e+00> : vector<2x8x16xf32>
    %64 = tpu.matmul %63, %43, %cst_24 {dimension_numbers = #tpu.dot_dimension_numbers<[2], [1], [1], [2], [0, 0, 0, 1, 1, 2], [0], [0]>} : vector<2x8x8xbf16>, vector<2x8x16xbf16>, vector<2x8x16xf32> -> vector<2x8x16xf32>
    "tpu.trace_stop"() : () -> ()
    %65 = vector.shape_cast %64 : vector<2x8x16xf32> to vector<16x16xf32>
    %66 = arith.truncf %65 : vector<16x16xf32> to vector<16x16xbf16>
    %67 = vector.extract_strided_slice %25 {offsets = [0, 0], sizes = [16, 32], strides = [1, 1]} : vector<32x32xbf16> to vector<16x32xbf16>
    %cst_25 = arith.constant dense<0.000000e+00> : vector<16x32xf32>
    %68 = tpu.matmul %66, %67, %cst_25 {dimension_numbers = #tpu.dot_dimension_numbers<[1], [0], [0], [1], [0, 0, 1, 1], [], []>} : vector<16x16xbf16>, vector<16x32xbf16>, vector<16x32xf32> -> vector<16x32xf32>
    %69 = arith.addf %39, %68 : vector<16x32xf32>
    %70 = vector.extract_strided_slice %37 {offsets = [0, 16], sizes = [16, 16], strides = [1, 1]} : vector<16x32xbf16> to vector<16x16xbf16>
    %71 = vector.shape_cast %70 : vector<16x16xbf16> to vector<2x8x16xbf16>
    %72 = vector.extract_strided_slice %38 {offsets = [0, 16], sizes = [16, 16], strides = [1, 1]} : vector<16x32xbf16> to vector<16x16xbf16>
    %73 = vector.shape_cast %72 : vector<16x16xbf16> to vector<2x8x16xbf16>
    "tpu.trace_start"() <{level = 10 : i32, message = "bqe,bke->bqk"}> : () -> ()
    %cst_26 = arith.constant dense<0.000000e+00> : vector<2x8x8xf32>
    %74 = tpu.matmul %71, %71, %cst_26 {dimension_numbers = #tpu.dot_dimension_numbers<[2], [2], [1], [1], [0, 0, 0, 1, 1, 1], [0], [0]>} : vector<2x8x16xbf16>, vector<2x8x16xbf16>, vector<2x8x8xf32> -> vector<2x8x8xf32>
    "tpu.trace_stop"() : () -> ()
    %cst_27 = arith.constant 2.500000e-01 : f32
    %75 = vector.broadcast %cst_27 : f32 to vector<2x8x8xf32>
    %76 = arith.mulf %74, %75 : vector<2x8x8xf32>
    %cst_28 = arith.constant -1.000000e+32 : f32
    %77 = vector.shape_cast %8 : vector<1x8x8xi1> to vector<1x8x8xi1>
    %78 = vector.broadcast %77 : vector<1x8x8xi1> to vector<2x8x8xi1>
    %79 = vector.broadcast %cst_28 : f32 to vector<2x8x8xf32>
    %80 = arith.select %78, %76, %79 : vector<2x8x8xi1>, vector<2x8x8xf32>
    %cst_29 = arith.constant dense<0xFF800000> : vector<2x8xf32>
    %81 = vector.multi_reduction <maximumf>, %80, %cst_29 [2] : vector<2x8x8xf32> to vector<2x8xf32>
    %82 = vector.shape_cast %81 : vector<2x8xf32> to vector<2x8x1xf32>
    %83 = vector.broadcast %82 : vector<2x8x1xf32> to vector<2x8x8xf32>
    %84 = arith.subf %80, %83 : vector<2x8x8xf32>
    %85 = math.exp %84 : vector<2x8x8xf32>
    %cst_30 = arith.constant dense<0.000000e+00> : vector<2x8xf32>
    %86 = vector.multi_reduction <add>, %85, %cst_30 [2] : vector<2x8x8xf32> to vector<2x8xf32>
    %87 = vector.shape_cast %86 : vector<2x8xf32> to vector<2x8x1xf32>
    %88 = tpu.reciprocal %87 {approx = true} : vector<2x8x1xf32> -> vector<2x8x1xf32>
    %89 = vector.broadcast %88 : vector<2x8x1xf32> to vector<2x8x8xf32>
    %90 = arith.mulf %85, %89 : vector<2x8x8xf32>
    %91 = vector.broadcast %13 : vector<1x8x8xf32> to vector<2x8x8xf32>
    %92 = arith.mulf %90, %91 : vector<2x8x8xf32>
    %93 = arith.truncf %92 : vector<2x8x8xf32> to vector<2x8x8xbf16>
    "tpu.trace_start"() <{level = 10 : i32, message = "bqk,bke->bqe"}> : () -> ()
    %cst_31 = arith.constant dense<0.000000e+00> : vector<2x8x16xf32>
    %94 = tpu.matmul %93, %73, %cst_31 {dimension_numbers = #tpu.dot_dimension_numbers<[2], [1], [1], [2], [0, 0, 0, 1, 1, 2], [0], [0]>} : vector<2x8x8xbf16>, vector<2x8x16xbf16>, vector<2x8x16xf32> -> vector<2x8x16xf32>
    "tpu.trace_stop"() : () -> ()
    %95 = vector.shape_cast %94 : vector<2x8x16xf32> to vector<16x16xf32>
    %96 = arith.truncf %95 : vector<16x16xf32> to vector<16x16xbf16>
    %97 = vector.extract_strided_slice %25 {offsets = [16, 0], sizes = [16, 32], strides = [1, 1]} : vector<32x32xbf16> to vector<16x32xbf16>
    %cst_32 = arith.constant dense<0.000000e+00> : vector<16x32xf32>
    %98 = tpu.matmul %96, %97, %cst_32 {dimension_numbers = #tpu.dot_dimension_numbers<[1], [0], [0], [1], [0, 0, 1, 1], [], []>} : vector<16x16xbf16>, vector<16x32xbf16>, vector<16x32xf32> -> vector<16x32xf32>
    %99 = arith.addf %69, %98 : vector<16x32xf32>
    %100 = vector.broadcast %18 : vector<1x32xf32> to vector<16x32xf32>
    %101 = arith.addf %99, %100 : vector<16x32xf32>
    %102 = arith.addf %1, %101 : vector<16x32xf32>
    %cst_33 = arith.constant dense<0.000000e+00> : vector<16xf32>
    %103 = vector.multi_reduction <add>, %102, %cst_33 [1] : vector<16x32xf32> to vector<16xf32>
    %104 = vector.shape_cast %103 : vector<16xf32> to vector<16x1xf32>
    %cst_34 = arith.constant 3.200000e+01 : f32
    %105 = vector.broadcast %cst_34 : f32 to vector<16x1xf32>
    %106 = arith.divf %104, %105 : vector<16x1xf32>
    %107 = vector.broadcast %106 : vector<16x1xf32> to vector<16x32xf32>
    %108 = arith.subf %102, %107 : vector<16x32xf32>
    %109 = arith.mulf %108, %108 : vector<16x32xf32>
    %cst_35 = arith.constant dense<0.000000e+00> : vector<16xf32>
    %110 = vector.multi_reduction <add>, %109, %cst_35 [1] : vector<16x32xf32> to vector<16xf32>
    %111 = vector.shape_cast %110 : vector<16xf32> to vector<16x1xf32>
    %cst_36 = arith.constant 3.200000e+01 : f32
    %112 = vector.broadcast %cst_36 : f32 to vector<16x1xf32>
    %113 = arith.divf %111, %112 : vector<16x1xf32>
    %114 = vector.broadcast %106 : vector<16x1xf32> to vector<16x32xf32>
    %115 = arith.subf %102, %114 : vector<16x32xf32>
    %cst_37 = arith.constant 9.99999974E-6 : f32
    %116 = vector.broadcast %cst_37 : f32 to vector<16x1xf32>
    %117 = arith.addf %113, %116 : vector<16x1xf32>
    %118 = math.rsqrt %117 : vector<16x1xf32>
    %119 = vector.broadcast %118 : vector<16x1xf32> to vector<16x32xf32>
    %120 = arith.mulf %115, %119 : vector<16x32xf32>
    %121 = vector.broadcast %19 : vector<1x32xf32> to vector<16x32xf32>
    %122 = arith.mulf %120, %121 : vector<16x32xf32>
    %123 = vector.broadcast %20 : vector<1x32xf32> to vector<16x32xf32>
    %124 = arith.addf %122, %123 : vector<16x32xf32>
    %125 = arith.truncf %124 : vector<16x32xf32> to vector<16x32xbf16>
    %c0_38 = arith.constant 0 : index
    %c0_39 = arith.constant 0 : index
    %c0_40 = arith.constant 0 : index
    %126 = vector.load %arg6[%c0_38, %c0_39, %c0_40] : memref<2x32x64xbf16, #tpu.memory_space<vmem>>, vector<1x32x64xbf16>
    %127 = vector.shape_cast %126 : vector<1x32x64xbf16> to vector<32x64xbf16>
    %cst_41 = arith.constant dense<0.000000e+00> : vector<16x64xf32>
    %128 = tpu.matmul %125, %127, %cst_41 {dimension_numbers = #tpu.dot_dimension_numbers<[1], [0], [0], [1], [0, 0, 1, 1], [], []>} : vector<16x32xbf16>, vector<32x64xbf16>, vector<16x64xf32> -> vector<16x64xf32>
    %c0_42 = arith.constant 0 : index
    %c0_43 = arith.constant 0 : index
    %c0_44 = arith.constant 0 : index
    %129 = vector.load %arg9[%c0_42, %c0_43, %c0_44] : memref<2x1x64xf32, #tpu.memory_space<vmem>>, vector<1x1x64xf32>
    %130 = vector.shape_cast %129 : vector<1x1x64xf32> to vector<1x64xf32>
    %131 = vector.broadcast %130 : vector<1x64xf32> to vector<16x64xf32>
    %132 = arith.addf %128, %131 : vector<16x64xf32>
    %cst_45 = arith.constant 0.000000e+00 : f32
    %133 = vector.broadcast %cst_45 : f32 to vector<16x64xf32>
    %134 = arith.maximumf %132, %133 : vector<16x64xf32>
    %135 = arith.truncf %134 : vector<16x64xf32> to vector<16x64xbf16>
    %c0_46 = arith.constant 0 : index
    %c0_47 = arith.constant 0 : index
    %c0_48 = arith.constant 0 : index
    %136 = vector.load %arg7[%c0_46, %c0_47, %c0_48] : memref<2x64x32xbf16, #tpu.memory_space<vmem>>, vector<1x64x32xbf16>
    %137 = vector.shape_cast %136 : vector<1x64x32xbf16> to vector<64x32xbf16>
    %cst_49 = arith.constant dense<0.000000e+00> : vector<16x32xf32>
    %138 = tpu.matmul %135, %137, %cst_49 {dimension_numbers = #tpu.dot_dimension_numbers<[1], [0], [0], [1], [0, 0, 1, 1], [], []>} : vector<16x64xbf16>, vector<64x32xbf16>, vector<16x32xf32> -> vector<16x32xf32>
    %139 = vector.broadcast %21 : vector<1x32xf32> to vector<16x32xf32>
    %140 = arith.addf %138, %139 : vector<16x32xf32>
    %141 = arith.addf %124, %140 : vector<16x32xf32>
    %cst_50 = arith.constant dense<0.000000e+00> : vector<16xf32>
    %142 = vector.multi_reduction <add>, %141, %cst_50 [1] : vector<16x32xf32> to vector<16xf32>
    %143 = vector.shape_cast %142 : vector<16xf32> to vector<16x1xf32>
    %cst_51 = arith.constant 3.200000e+01 : f32
    %144 = vector.broadcast %cst_51 : f32 to vector<16x1xf32>
    %145 = arith.divf %143, %144 : vector<16x1xf32>
    %146 = vector.broadcast %145 : vector<16x1xf32> to vector<16x32xf32>
    %147 = arith.subf %141, %146 : vector<16x32xf32>
    %148 = arith.mulf %147, %147 : vector<16x32xf32>
    %cst_52 = arith.constant dense<0.000000e+00> : vector<16xf32>
    %149 = vector.multi_reduction <add>, %148, %cst_52 [1] : vector<16x32xf32> to vector<16xf32>
    %150 = vector.shape_cast %149 : vector<16xf32> to vector<16x1xf32>
    %cst_53 = arith.constant 3.200000e+01 : f32
    %151 = vector.broadcast %cst_53 : f32 to vector<16x1xf32>
    %152 = arith.divf %150, %151 : vector<16x1xf32>
    %153 = vector.broadcast %145 : vector<16x1xf32> to vector<16x32xf32>
    %154 = arith.subf %141, %153 : vector<16x32xf32>
    %cst_54 = arith.constant 9.99999974E-6 : f32
    %155 = vector.broadcast %cst_54 : f32 to vector<16x1xf32>
    %156 = arith.addf %152, %155 : vector<16x1xf32>
    %157 = math.rsqrt %156 : vector<16x1xf32>
    %158 = vector.broadcast %157 : vector<16x1xf32> to vector<16x32xf32>
    %159 = arith.mulf %154, %158 : vector<16x32xf32>
    %160 = vector.broadcast %22 : vector<1x32xf32> to vector<16x32xf32>
    %161 = arith.mulf %159, %160 : vector<16x32xf32>
    %162 = vector.broadcast %23 : vector<1x32xf32> to vector<16x32xf32>
    %163 = arith.addf %161, %162 : vector<16x32xf32>
    %c1 = arith.constant 1 : index
    %c0_55 = arith.constant 0 : index
    %c0_56 = arith.constant 0 : index
    %164 = vector.load %arg8[%c1, %c0_55, %c0_56] : memref<2x8x32xf32, #tpu.memory_space<vmem>>, vector<1x8x32xf32>
    %165 = vector.shape_cast %164 : vector<1x8x32xf32> to vector<8x32xf32>
    %166 = vector.extract_strided_slice %165 {offsets = [0, 0], sizes = [1, 32], strides = [1, 1]} : vector<8x32xf32> to vector<1x32xf32>
    %167 = vector.extract_strided_slice %165 {offsets = [1, 0], sizes = [1, 32], strides = [1, 1]} : vector<8x32xf32> to vector<1x32xf32>
    %168 = vector.extract_strided_slice %165 {offsets = [2, 0], sizes = [1, 32], strides = [1, 1]} : vector<8x32xf32> to vector<1x32xf32>
    %169 = vector.extract_strided_slice %165 {offsets = [3, 0], sizes = [1, 32], strides = [1, 1]} : vector<8x32xf32> to vector<1x32xf32>
    %170 = vector.extract_strided_slice %165 {offsets = [4, 0], sizes = [1, 32], strides = [1, 1]} : vector<8x32xf32> to vector<1x32xf32>
    %171 = vector.extract_strided_slice %165 {offsets = [5, 0], sizes = [1, 32], strides = [1, 1]} : vector<8x32xf32> to vector<1x32xf32>
    %172 = vector.extract_strided_slice %165 {offsets = [6, 0], sizes = [1, 32], strides = [1, 1]} : vector<8x32xf32> to vector<1x32xf32>
    %173 = vector.extract_strided_slice %165 {offsets = [7, 0], sizes = [1, 32], strides = [1, 1]} : vector<8x32xf32> to vector<1x32xf32>
    %c1_57 = arith.constant 1 : index
    %c0_58 = arith.constant 0 : index
    %c0_59 = arith.constant 0 : index
    %174 = vector.load %arg5[%c1_57, %c0_58, %c0_59] : memref<2x32x32xbf16, #tpu.memory_space<vmem>>, vector<1x32x32xbf16>
    %175 = vector.shape_cast %174 : vector<1x32x32xbf16> to vector<32x32xbf16>
    %176 = arith.truncf %163 : vector<16x32xf32> to vector<16x32xbf16>
    %c1_60 = arith.constant 1 : index
    %c0_61 = arith.constant 0 : index
    %c0_62 = arith.constant 0 : index
    %177 = vector.load %arg3[%c1_60, %c0_61, %c0_62] : memref<2x32x32xbf16, #tpu.memory_space<vmem>>, vector<1x32x32xbf16>
    %178 = vector.shape_cast %177 : vector<1x32x32xbf16> to vector<32x32xbf16>
    %cst_63 = arith.constant dense<0.000000e+00> : vector<16x32xf32>
    %179 = tpu.matmul %176, %178, %cst_63 {dimension_numbers = #tpu.dot_dimension_numbers<[1], [0], [0], [1], [0, 0, 1, 1], [], []>} : vector<16x32xbf16>, vector<32x32xbf16>, vector<16x32xf32> -> vector<16x32xf32>
    %180 = vector.broadcast %166 : vector<1x32xf32> to vector<16x32xf32>
    %181 = arith.addf %179, %180 : vector<16x32xf32>
    %c1_64 = arith.constant 1 : index
    %c0_65 = arith.constant 0 : index
    %c0_66 = arith.constant 0 : index
    %182 = vector.load %arg4[%c1_64, %c0_65, %c0_66] : memref<2x32x32xbf16, #tpu.memory_space<vmem>>, vector<1x32x32xbf16>
    %183 = vector.shape_cast %182 : vector<1x32x32xbf16> to vector<32x32xbf16>
    %cst_67 = arith.constant dense<0.000000e+00> : vector<16x32xf32>
    %184 = tpu.matmul %4, %183, %cst_67 {dimension_numbers = #tpu.dot_dimension_numbers<[1], [0], [0], [1], [0, 0, 1, 1], [], []>} : vector<16x32xbf16>, vector<32x32xbf16>, vector<16x32xf32> -> vector<16x32xf32>
    %185 = vector.broadcast %167 : vector<1x32xf32> to vector<16x32xf32>
    %186 = arith.addf %184, %185 : vector<16x32xf32>
    %187 = arith.truncf %181 : vector<16x32xf32> to vector<16x32xbf16>
    %188 = arith.truncf %186 : vector<16x32xf32> to vector<16x32xbf16>
    %cst_68 = arith.constant 0.000000e+00 : f32
    %189 = vector.broadcast %cst_68 : f32 to vector<16x32xf32>
    %190 = vector.extract_strided_slice %187 {offsets = [0, 0], sizes = [16, 16], strides = [1, 1]} : vector<16x32xbf16> to vector<16x16xbf16>
    %191 = vector.shape_cast %190 : vector<16x16xbf16> to vector<2x8x16xbf16>
    %192 = vector.extract_strided_slice %188 {offsets = [0, 0], sizes = [16, 16], strides = [1, 1]} : vector<16x32xbf16> to vector<16x16xbf16>
    %193 = vector.shape_cast %192 : vector<16x16xbf16> to vector<2x8x16xbf16>
    "tpu.trace_start"() <{level = 10 : i32, message = "bqe,bke->bqk"}> : () -> ()
    %cst_69 = arith.constant dense<0.000000e+00> : vector<2x8x8xf32>
    %194 = tpu.matmul %191, %191, %cst_69 {dimension_numbers = #tpu.dot_dimension_numbers<[2], [2], [1], [1], [0, 0, 0, 1, 1, 1], [0], [0]>} : vector<2x8x16xbf16>, vector<2x8x16xbf16>, vector<2x8x8xf32> -> vector<2x8x8xf32>
    "tpu.trace_stop"() : () -> ()
    %cst_70 = arith.constant 2.500000e-01 : f32
    %195 = vector.broadcast %cst_70 : f32 to vector<2x8x8xf32>
    %196 = arith.mulf %194, %195 : vector<2x8x8xf32>
    %cst_71 = arith.constant -1.000000e+32 : f32
    %197 = vector.shape_cast %8 : vector<1x8x8xi1> to vector<1x8x8xi1>
    %198 = vector.broadcast %197 : vector<1x8x8xi1> to vector<2x8x8xi1>
    %199 = vector.broadcast %cst_71 : f32 to vector<2x8x8xf32>
    %200 = arith.select %198, %196, %199 : vector<2x8x8xi1>, vector<2x8x8xf32>
    %cst_72 = arith.constant dense<0xFF800000> : vector<2x8xf32>
    %201 = vector.multi_reduction <maximumf>, %200, %cst_72 [2] : vector<2x8x8xf32> to vector<2x8xf32>
    %202 = vector.shape_cast %201 : vector<2x8xf32> to vector<2x8x1xf32>
    %203 = vector.broadcast %202 : vector<2x8x1xf32> to vector<2x8x8xf32>
    %204 = arith.subf %200, %203 : vector<2x8x8xf32>
    %205 = math.exp %204 : vector<2x8x8xf32>
    %cst_73 = arith.constant dense<0.000000e+00> : vector<2x8xf32>
    %206 = vector.multi_reduction <add>, %205, %cst_73 [2] : vector<2x8x8xf32> to vector<2x8xf32>
    %207 = vector.shape_cast %206 : vector<2x8xf32> to vector<2x8x1xf32>
    %208 = vector.broadcast %207 : vector<2x8x1xf32> to vector<2x8x8xf32>
    %209 = arith.divf %205, %208 : vector<2x8x8xf32>
    %c0_74 = arith.constant 0 : index
    %c0_75 = arith.constant 0 : index
    %c0_76 = arith.constant 0 : index
    %210 = vector.load %arg11[%c0_74, %c0_75, %c0_76] : memref<2x16x8xf32, #tpu.memory_space<vmem>>, vector<2x8x8xf32>
    tpu.vector_store %arg11[%c0_74, %c0_75, %c0_76], %209 {strides = array<i32>} : memref<2x16x8xf32, #tpu.memory_space<vmem>>, vector<2x8x8xf32>,
    %211 = vector.broadcast %13 : vector<1x8x8xf32> to vector<2x8x8xf32>
    %212 = arith.mulf %209, %211 : vector<2x8x8xf32>
    %213 = arith.truncf %212 : vector<2x8x8xf32> to vector<2x8x8xbf16>
    "tpu.trace_start"() <{level = 10 : i32, message = "bqk,bke->bqe"}> : () -> ()
    %cst_77 = arith.constant dense<0.000000e+00> : vector<2x8x16xf32>
    %214 = tpu.matmul %213, %193, %cst_77 {dimension_numbers = #tpu.dot_dimension_numbers<[2], [1], [1], [2], [0, 0, 0, 1, 1, 2], [0], [0]>} : vector<2x8x8xbf16>, vector<2x8x16xbf16>, vector<2x8x16xf32> -> vector<2x8x16xf32>
    "tpu.trace_stop"() : () -> ()
    %215 = vector.shape_cast %214 : vector<2x8x16xf32> to vector<16x16xf32>
    %216 = arith.truncf %215 : vector<16x16xf32> to vector<16x16xbf16>
    %217 = vector.extract_strided_slice %175 {offsets = [0, 0], sizes = [16, 32], strides = [1, 1]} : vector<32x32xbf16> to vector<16x32xbf16>
    %cst_78 = arith.constant dense<0.000000e+00> : vector<16x32xf32>
    %218 = tpu.matmul %216, %217, %cst_78 {dimension_numbers = #tpu.dot_dimension_numbers<[1], [0], [0], [1], [0, 0, 1, 1], [], []>} : vector<16x16xbf16>, vector<16x32xbf16>, vector<16x32xf32> -> vector<16x32xf32>
    %219 = arith.addf %189, %218 : vector<16x32xf32>
    %220 = vector.extract_strided_slice %187 {offsets = [0, 16], sizes = [16, 16], strides = [1, 1]} : vector<16x32xbf16> to vector<16x16xbf16>
    %221 = vector.shape_cast %220 : vector<16x16xbf16> to vector<2x8x16xbf16>
    %222 = vector.extract_strided_slice %188 {offsets = [0, 16], sizes = [16, 16], strides = [1, 1]} : vector<16x32xbf16> to vector<16x16xbf16>
    %223 = vector.shape_cast %222 : vector<16x16xbf16> to vector<2x8x16xbf16>
    "tpu.trace_start"() <{level = 10 : i32, message = "bqe,bke->bqk"}> : () -> ()
    %cst_79 = arith.constant dense<0.000000e+00> : vector<2x8x8xf32>
    %224 = tpu.matmul %221, %221, %cst_79 {dimension_numbers = #tpu.dot_dimension_numbers<[2], [2], [1], [1], [0, 0, 0, 1, 1, 1], [0], [0]>} : vector<2x8x16xbf16>, vector<2x8x16xbf16>, vector<2x8x8xf32> -> vector<2x8x8xf32>
    "tpu.trace_stop"() : () -> ()
    %cst_80 = arith.constant 2.500000e-01 : f32
    %225 = vector.broadcast %cst_80 : f32 to vector<2x8x8xf32>
    %226 = arith.mulf %224, %225 : vector<2x8x8xf32>
    %cst_81 = arith.constant -1.000000e+32 : f32
    %227 = vector.shape_cast %8 : vector<1x8x8xi1> to vector<1x8x8xi1>
    %228 = vector.broadcast %227 : vector<1x8x8xi1> to vector<2x8x8xi1>
    %229 = vector.broadcast %cst_81 : f32 to vector<2x8x8xf32>
    %230 = arith.select %228, %226, %229 : vector<2x8x8xi1>, vector<2x8x8xf32>
    %cst_82 = arith.constant dense<0xFF800000> : vector<2x8xf32>
    %231 = vector.multi_reduction <maximumf>, %230, %cst_82 [2] : vector<2x8x8xf32> to vector<2x8xf32>
    %232 = vector.shape_cast %231 : vector<2x8xf32> to vector<2x8x1xf32>
    %233 = vector.broadcast %232 : vector<2x8x1xf32> to vector<2x8x8xf32>
    %234 = arith.subf %230, %233 : vector<2x8x8xf32>
    %235 = math.exp %234 : vector<2x8x8xf32>
    %cst_83 = arith.constant dense<0.000000e+00> : vector<2x8xf32>
    %236 = vector.multi_reduction <add>, %235, %cst_83 [2] : vector<2x8x8xf32> to vector<2x8xf32>
    %237 = vector.shape_cast %236 : vector<2x8xf32> to vector<2x8x1xf32>
    %238 = vector.broadcast %237 : vector<2x8x1xf32> to vector<2x8x8xf32>
    %239 = arith.divf %235, %238 : vector<2x8x8xf32>
    %c0_84 = arith.constant 0 : index
    %c8 = arith.constant 8 : index
    %c0_85 = arith.constant 0 : index
    %240 = vector.load %arg11[%c0_84, %c8, %c0_85] : memref<2x16x8xf32, #tpu.memory_space<vmem>>, vector<2x8x8xf32>
    tpu.vector_store %arg11[%c0_84, %c8, %c0_85], %239 {strides = array<i32>} : memref<2x16x8xf32, #tpu.memory_space<vmem>>, vector<2x8x8xf32>,
    %241 = vector.broadcast %13 : vector<1x8x8xf32> to vector<2x8x8xf32>
    %242 = arith.mulf %239, %241 : vector<2x8x8xf32>
    %243 = arith.truncf %242 : vector<2x8x8xf32> to vector<2x8x8xbf16>
    "tpu.trace_start"() <{level = 10 : i32, message = "bqk,bke->bqe"}> : () -> ()
    %cst_86 = arith.constant dense<0.000000e+00> : vector<2x8x16xf32>
    %244 = tpu.matmul %243, %223, %cst_86 {dimension_numbers = #tpu.dot_dimension_numbers<[2], [1], [1], [2], [0, 0, 0, 1, 1, 2], [0], [0]>} : vector<2x8x8xbf16>, vector<2x8x16xbf16>, vector<2x8x16xf32> -> vector<2x8x16xf32>
    "tpu.trace_stop"() : () -> ()
    %245 = vector.shape_cast %244 : vector<2x8x16xf32> to vector<16x16xf32>
    %246 = arith.truncf %245 : vector<16x16xf32> to vector<16x16xbf16>
    %247 = vector.extract_strided_slice %175 {offsets = [16, 0], sizes = [16, 32], strides = [1, 1]} : vector<32x32xbf16> to vector<16x32xbf16>
    %cst_87 = arith.constant dense<0.000000e+00> : vector<16x32xf32>
    %248 = tpu.matmul %246, %247, %cst_87 {dimension_numbers = #tpu.dot_dimension_numbers<[1], [0], [0], [1], [0, 0, 1, 1], [], []>} : vector<16x16xbf16>, vector<16x32xbf16>, vector<16x32xf32> -> vector<16x32xf32>
    %249 = arith.addf %219, %248 : vector<16x32xf32>
    %250 = vector.broadcast %168 : vector<1x32xf32> to vector<16x32xf32>
    %251 = arith.addf %249, %250 : vector<16x32xf32>
    %252 = arith.addf %163, %251 : vector<16x32xf32>
    %cst_88 = arith.constant dense<0.000000e+00> : vector<16xf32>
    %253 = vector.multi_reduction <add>, %252, %cst_88 [1] : vector<16x32xf32> to vector<16xf32>
    %254 = vector.shape_cast %253 : vector<16xf32> to vector<16x1xf32>
    %cst_89 = arith.constant 3.200000e+01 : f32
    %255 = vector.broadcast %cst_89 : f32 to vector<16x1xf32>
    %256 = arith.divf %254, %255 : vector<16x1xf32>
    %257 = vector.broadcast %256 : vector<16x1xf32> to vector<16x32xf32>
    %258 = arith.subf %252, %257 : vector<16x32xf32>
    %259 = arith.mulf %258, %258 : vector<16x32xf32>
    %cst_90 = arith.constant dense<0.000000e+00> : vector<16xf32>
    %260 = vector.multi_reduction <add>, %259, %cst_90 [1] : vector<16x32xf32> to vector<16xf32>
    %261 = vector.shape_cast %260 : vector<16xf32> to vector<16x1xf32>
    %cst_91 = arith.constant 3.200000e+01 : f32
    %262 = vector.broadcast %cst_91 : f32 to vector<16x1xf32>
    %263 = arith.divf %261, %262 : vector<16x1xf32>
    %264 = vector.broadcast %256 : vector<16x1xf32> to vector<16x32xf32>
    %265 = arith.subf %252, %264 : vector<16x32xf32>
    %cst_92 = arith.constant 9.99999974E-6 : f32
    %266 = vector.broadcast %cst_92 : f32 to vector<16x1xf32>
    %267 = arith.addf %263, %266 : vector<16x1xf32>
    %268 = math.rsqrt %267 : vector<16x1xf32>
    %269 = vector.broadcast %268 : vector<16x1xf32> to vector<16x32xf32>
    %270 = arith.mulf %265, %269 : vector<16x32xf32>
    %271 = vector.broadcast %169 : vector<1x32xf32> to vector<16x32xf32>
    %272 = arith.mulf %270, %271 : vector<16x32xf32>
    %273 = vector.broadcast %170 : vector<1x32xf32> to vector<16x32xf32>
    %274 = arith.addf %272, %273 : vector<16x32xf32>
    %275 = arith.truncf %274 : vector<16x32xf32> to vector<16x32xbf16>
    %c1_93 = arith.constant 1 : index
    %c0_94 = arith.constant 0 : index
    %c0_95 = arith.constant 0 : index
    %276 = vector.load %arg6[%c1_93, %c0_94, %c0_95] : memref<2x32x64xbf16, #tpu.memory_space<vmem>>, vector<1x32x64xbf16>
    %277 = vector.shape_cast %276 : vector<1x32x64xbf16> to vector<32x64xbf16>
    %cst_96 = arith.constant dense<0.000000e+00> : vector<16x64xf32>
    %278 = tpu.matmul %275, %277, %cst_96 {dimension_numbers = #tpu.dot_dimension_numbers<[1], [0], [0], [1], [0, 0, 1, 1], [], []>} : vector<16x32xbf16>, vector<32x64xbf16>, vector<16x64xf32> -> vector<16x64xf32>
    %c1_97 = arith.constant 1 : index
    %c0_98 = arith.constant 0 : index
    %c0_99 = arith.constant 0 : index
    %279 = vector.load %arg9[%c1_97, %c0_98, %c0_99] : memref<2x1x64xf32, #tpu.memory_space<vmem>>, vector<1x1x64xf32>
    %280 = vector.shape_cast %279 : vector<1x1x64xf32> to vector<1x64xf32>
    %281 = vector.broadcast %280 : vector<1x64xf32> to vector<16x64xf32>
    %282 = arith.addf %278, %281 : vector<16x64xf32>
    %cst_100 = arith.constant 0.000000e+00 : f32
    %283 = vector.broadcast %cst_100 : f32 to vector<16x64xf32>
    %284 = arith.maximumf %282, %283 : vector<16x64xf32>
    %285 = arith.truncf %284 : vector<16x64xf32> to vector<16x64xbf16>
    %c1_101 = arith.constant 1 : index
    %c0_102 = arith.constant 0 : index
    %c0_103 = arith.constant 0 : index
    %286 = vector.load %arg7[%c1_101, %c0_102, %c0_103] : memref<2x64x32xbf16, #tpu.memory_space<vmem>>, vector<1x64x32xbf16>
    %287 = vector.shape_cast %286 : vector<1x64x32xbf16> to vector<64x32xbf16>
    %cst_104 = arith.constant dense<0.000000e+00> : vector<16x32xf32>
    %288 = tpu.matmul %285, %287, %cst_104 {dimension_numbers = #tpu.dot_dimension_numbers<[1], [0], [0], [1], [0, 0, 1, 1], [], []>} : vector<16x64xbf16>, vector<64x32xbf16>, vector<16x32xf32> -> vector<16x32xf32>
    %289 = vector.broadcast %171 : vector<1x32xf32> to vector<16x32xf32>
    %290 = arith.addf %288, %289 : vector<16x32xf32>
    %291 = arith.addf %274, %290 : vector<16x32xf32>
    %cst_105 = arith.constant dense<0.000000e+00> : vector<16xf32>
    %292 = vector.multi_reduction <add>, %291, %cst_105 [1] : vector<16x32xf32> to vector<16xf32>
    %293 = vector.shape_cast %292 : vector<16xf32> to vector<16x1xf32>
    %cst_106 = arith.constant 3.200000e+01 : f32
    %294 = vector.broadcast %cst_106 : f32 to vector<16x1xf32>
    %295 = arith.divf %293, %294 : vector<16x1xf32>
    %296 = vector.broadcast %295 : vector<16x1xf32> to vector<16x32xf32>
    %297 = arith.subf %291, %296 : vector<16x32xf32>
    %298 = arith.mulf %297, %297 : vector<16x32xf32>
    %cst_107 = arith.constant dense<0.000000e+00> : vector<16xf32>
    %299 = vector.multi_reduction <add>, %298, %cst_107 [1] : vector<16x32xf32> to vector<16xf32>
    %300 = vector.shape_cast %299 : vector<16xf32> to vector<16x1xf32>
    %cst_108 = arith.constant 3.200000e+01 : f32
    %301 = vector.broadcast %cst_108 : f32 to vector<16x1xf32>
    %302 = arith.divf %300, %301 : vector<16x1xf32>
    %303 = vector.broadcast %295 : vector<16x1xf32> to vector<16x32xf32>
    %304 = arith.subf %291, %303 : vector<16x32xf32>
    %cst_109 = arith.constant 9.99999974E-6 : f32
    %305 = vector.broadcast %cst_109 : f32 to vector<16x1xf32>
    %306 = arith.addf %302, %305 : vector<16x1xf32>
    %307 = math.rsqrt %306 : vector<16x1xf32>
    %308 = vector.broadcast %307 : vector<16x1xf32> to vector<16x32xf32>
    %309 = arith.mulf %304, %308 : vector<16x32xf32>
    %310 = vector.broadcast %172 : vector<1x32xf32> to vector<16x32xf32>
    %311 = arith.mulf %309, %310 : vector<16x32xf32>
    %312 = vector.broadcast %173 : vector<1x32xf32> to vector<16x32xf32>
    %313 = arith.addf %311, %312 : vector<16x32xf32>
    %314 = vector.shape_cast %313 : vector<16x32xf32> to vector<2x8x32xf32>
    %c0_110 = arith.constant 0 : index
    %c0_111 = arith.constant 0 : index
    %c0_112 = arith.constant 0 : index
    %315 = vector.load %arg10[%c0_110, %c0_111, %c0_112] : memref<2x8x32xf32, #tpu.memory_space<vmem>>, vector<2x8x32xf32>
    tpu.vector_store %arg10[%c0_110, %c0_111, %c0_112], %314 {strides = array<i32>} : memref<2x8x32xf32, #tpu.memory_space<vmem>>, vector<2x8x32xf32>,
    return
  }
  func.func @transform_0(%arg0: i32) -> (i32, i32, i32) {
    %c0_i32 = arith.constant 0 : i32
    %c0_i32_0 = arith.constant 0 : i32
    %c0_i32_1 = arith.constant 0 : i32
    return %arg0, %c0_i32, %c0_i32_0 : i32, i32, i32
  }
  func.func @transform_1(%arg0: i32) -> (i32, i32, i32) {
    %c0_i32 = arith.constant 0 : i32
    %c0_i32_0 = arith.constant 0 : i32
    %c0_i32_1 = arith.constant 0 : i32
    return %arg0, %c0_i32, %c0_i32_0 : i32, i32, i32
  }
  func.func @transform_2(%arg0: i32) -> (i32, i32, i32) {
    %c0_i32 = arith.constant 0 : i32
    %c0_i32_0 = arith.constant 0 : i32
    %c0_i32_1 = arith.constant 0 : i32
    %c0_i32_2 = arith.constant 0 : i32
    return %c0_i32, %c0_i32_0, %c0_i32_1 : i32, i32, i32
  }
  func.func @transform_3(%arg0: i32) -> (i32, i32, i32) {
    %c0_i32 = arith.constant 0 : i32
    %c0_i32_0 = arith.constant 0 : i32
    %c0_i32_1 = arith.constant 0 : i32
    %c0_i32_2 = arith.constant 0 : i32
    return %c0_i32, %c0_i32_0, %c0_i32_1 : i32, i32, i32
  }
  func.func @transform_4(%arg0: i32) -> (i32, i32, i32) {
    %c0_i32 = arith.constant 0 : i32
    %c0_i32_0 = arith.constant 0 : i32
    %c0_i32_1 = arith.constant 0 : i32
    %c0_i32_2 = arith.constant 0 : i32
    return %c0_i32, %c0_i32_0, %c0_i32_1 : i32, i32, i32
  }
  func.func @transform_5(%arg0: i32) -> (i32, i32, i32) {
    %c0_i32 = arith.constant 0 : i32
    %c0_i32_0 = arith.constant 0 : i32
    %c0_i32_1 = arith.constant 0 : i32
    %c0_i32_2 = arith.constant 0 : i32
    return %c0_i32, %c0_i32_0, %c0_i32_1 : i32, i32, i32
  }
  func.func @transform_6(%arg0: i32) -> (i32, i32, i32) {
    %c0_i32 = arith.constant 0 : i32
    %c0_i32_0 = arith.constant 0 : i32
    %c0_i32_1 = arith.constant 0 : i32
    %c0_i32_2 = arith.constant 0 : i32
    return %c0_i32, %c0_i32_0, %c0_i32_1 : i32, i32, i32
  }
  func.func @transform_7(%arg0: i32) -> (i32, i32, i32) {
    %c0_i32 = arith.constant 0 : i32
    %c0_i32_0 = arith.constant 0 : i32
    %c0_i32_1 = arith.constant 0 : i32
    %c0_i32_2 = arith.constant 0 : i32
    return %c0_i32, %c0_i32_0, %c0_i32_1 : i32, i32, i32
  }
  func.func @transform_8(%arg0: i32) -> (i32, i32, i32) {
    %c0_i32 = arith.constant 0 : i32
    %c0_i32_0 = arith.constant 0 : i32
    %c0_i32_1 = arith.constant 0 : i32
    %c0_i32_2 = arith.constant 0 : i32
    return %c0_i32, %c0_i32_0, %c0_i32_1 : i32, i32, i32
  }
  func.func @transform_9(%arg0: i32) -> (i32, i32, i32) {
    %c0_i32 = arith.constant 0 : i32
    %c0_i32_0 = arith.constant 0 : i32
    %c0_i32_1 = arith.constant 0 : i32
    return %arg0, %c0_i32, %c0_i32_0 : i32, i32, i32
  }
  func.func @transform_10(%arg0: i32) -> (i32, i32, i32) {
    %c0_i32 = arith.constant 0 : i32
    %c0_i32_0 = arith.constant 0 : i32
    %c0_i32_1 = arith.constant 0 : i32
    return %arg0, %c0_i32, %c0_i32_0 : i32, i32, i32
  }
}

</mosaic_0001>

<bundles_post_ra>
// kernel: tpu_custom_call.1
= control target key start
LH: loop header
LB: loop body
LE: loop exit
PB: predicated region body
PF: predicated region fallthrough
CT: control target
= control target key end

     0   :  { %16 = vsyncpa [#allocation3], 0  ;;  %s3014_s0 = inlined_call_operand.hbm [shape: f32[2,8,32], index: 0, kind: input, shape index: {}]   ;;  %s3015_s1 = inlined_call_operand.hbm [shape: f32[2,8,32], index: 1, kind: input, shape index: {}]   ;;  %s3016_s2 = inlined_call_operand.vmem [shape: bf16[2,32,32], index: 2, kind: input, shape index: {}]   ;;  %s3017_s3 = inlined_call_operand.vmem [shape: bf16[2,32,32], index: 3, kind: input, shape index: {}]   ;;  %s3018_s4 = inlined_call_operand.vmem [shape: bf16[2,32,32], index: 4, kind: input, shape index: {}]   ;;  %s3019_s5 = inlined_call_operand.hbm [shape: bf16[2,32,64], index: 5, kind: input, shape index: {}]   ;;  %s3020_s6 = inlined_call_operand.vmem [shape: bf16[2,64,32], index: 6, kind: input, shape index: {}]   ;;  %s3021_s7 = inlined_call_operand.hbm [shape: f32[2,8,32], index: 7, kind: input, shape index: {}]   ;;  %s3022_s8 = inlined_call_operand.vmem [shape: f32[2,1,64], index: 8, kind: input, shape index: {}]   ;;  %s3023_s9 = inlined_call_operand.hbm [shape: f32[2,8,32], index: 9, kind: output, shape index: {0}]   ;;  %s3024_s10 = inlined_call_operand.vmem [shape: f32[2,16,8], index: 10, kind: output, shape index: {1}]  }
   0x1   :  { %17 = vsyncpa [#allocation6], 0 }
   0x2   :  { %18 = vsyncpa [#allocation9], 0 }
   0x3   :  { %19 = vsyncpa [#allocation4], 0  ;;  %s2507_s13 = smov [#allocation5]   ;;  %s2508_s15 = smov [#allocation2]  }
   0x4   :  { %s37_s14 = sshll.u32 %s2507_s13, 4  ;;  %s25_s16 = sshll.u32 %s2508_s15, 4  ;;  %s38_s14 = int_to_ptr.vmem [resolvable:$true] %s37_s14  ;;  %s26_s16 = int_to_ptr.vmem [resolvable:$true] %s25_s16 }
   0x5   :  { %s2407_s17 = scalar_lea.vmem %s38_s14, 256  ;;  %p2412_p1 = scmp.lt.s32.totalorder %s38_s14, %s38_s14 }
   0x6   :  { %p2408_p0 = scmp.ne.s32.totalorder %s38_s14, %s2407_s17  ;;  %p2413_p2 = scmp.lt.s32.totalorder %s2407_s17, %s2407_s17 }
   0x8   :  { %p2414_p3 = por %p2413_p2, %p2412_p1 }
   0xa   :  { %p2415_p4 = pnand %p2414_p3, %p2408_p0 }
   0xc   :  { %2418 = shalt.err (!%p2415_p4)
}
   0xd   :  { %s2509_s18 = smov 128   ;;  %s2510_s19 = smov 8  }
   0xe   :  { %43 = dma.hbm_to_vmem [thread:$0]  %s3015_s1, 256, %s38_s14, [#allocation6], %s2509_s18, %s2509_s18, %s2510_s19  }
   0xf   :  { %s2427_s22 = scalar_lea.vmem %s26_s16, 256  ;;  %p2432_p6 = scmp.lt.s32.totalorder %s26_s16, %s26_s16 }
  0x10   :  { %p2428_p5 = scmp.ne.s32.totalorder %s26_s16, %s2427_s22  ;;  %p2433_p7 = scmp.lt.s32.totalorder %s2427_s22, %s2427_s22 }
  0x12   :  { %p2434_p8 = por %p2433_p7, %p2432_p6 }
  0x14   :  { %p2435_p9 = pnand %p2434_p8, %p2428_p5 }
  0x16   :  { %2438 = shalt.err (!%p2435_p9)
}
  0x17   :  { %31 = dma.hbm_to_vmem [thread:$0]  %s3014_s0, 256, %s26_s16, [#allocation3], %s2509_s18, %s2509_s18, %s2510_s19  }
  0x18   :  { %s2511_s25 = smov [#allocation7]  }
  0x19   :  { %s55_s26 = sshll.u32 %s2511_s25, 4  ;;  %s56_s26 = int_to_ptr.vmem [resolvable:$true] %s55_s26 }
  0x1a   :  { %s2447_s27 = scalar_lea.vmem %s56_s26, 512  ;;  %p2452_p11 = scmp.lt.s32.totalorder %s56_s26, %s56_s26 }
  0x1b   :  { %p2448_p10 = scmp.ne.s32.totalorder %s56_s26, %s2447_s27  ;;  %p2453_p12 = scmp.lt.s32.totalorder %s2447_s27, %s2447_s27 }
  0x1d   :  { %p2454_p13 = por %p2453_p12, %p2452_p11 }
  0x1f   :  { %p2455_p0 = pnand %p2454_p13, %p2448_p10 }
  0x21   :  { %2458 = shalt.err (!%p2455_p0)
}
  0x22   :  { %s2512_s1 = smov 64   ;;  %s2513_s28 = smov 4  }
  0x23   :  { %61 = dma.hbm_to_vmem [thread:$0]  %s3019_s5, 512, %s56_s26, [#allocation6], %s2512_s1, %s2512_s1, %s2513_s28  }
  0x24   :  { %s2514_s11 = smov [#allocation8]  }
  0x25   :  { %s69_s12 = sshll.u32 %s2514_s11, 4  ;;  %s70_s12 = int_to_ptr.vmem [resolvable:$true] %s69_s12 }
  0x26   :  { %s2467_s0 = scalar_lea.vmem %s70_s12, 256  ;;  %p2472_p2 = scmp.lt.s32.totalorder %s70_s12, %s70_s12 }
  0x27   :  { %p2468_p1 = scmp.ne.s32.totalorder %s70_s12, %s2467_s0  ;;  %p2473_p3 = scmp.lt.s32.totalorder %s2467_s0, %s2467_s0 }
  0x29   :  { %p2474_p4 = por %p2473_p3, %p2472_p2 }
  0x2b   :  { %p2475_p5 = pnand %p2474_p4, %p2468_p1 }
  0x2d   :  { %2478 = shalt.err (!%p2475_p5)
}
  0x2e   :  { %75 = dma.hbm_to_vmem [thread:$0]  %s3021_s7, 256, %s70_s12, [#allocation9], %s2509_s18, %s2509_s18, %s2510_s19  }
  0x2f   :  { %2499 = dma.done.wait [#allocation3], 256  }
  0x30   :  { %2500 = vsyncadd [#allocation3], 4294967040 }
  0x31   :  { %2501 = dma.done.wait [#allocation6], 768  }
  0x32   :  { %2502 = vsyncadd [#allocation6], 4294966528 }
  0x33   :  { %2503 = dma.done.wait [#allocation9], 256  }
  0x34   :  { %2504 = vsyncadd [#allocation9], 4294967040  ;;  %v2515_v0 = vmov 0.0   ;;  %vm2516_vm0 = vmmov 0   ;;  %v2327_v1 = vld [vmem:[%s3016_s2 + $0x8] sm:$0xff]   ;;  %v2328_v2 = vld [vmem:[%s3016_s2] sm:$0xff]   ;;  %v96_v11 = vlaneseq }
  0x35   :  { %2123 = vmatprep.subr.bf16.mxu1 %v2515_v0  ;;  %2127 = vmatprep.mubr.msk.bf16.mxu1 %vm2516_vm0, %v2515_v0  ;;  %v2607_v3 = vld [vmem:[#allocation2] sm:$0xff]  ;;  %v2609_v4 = vld [vmem:[#allocation2 + $0x8] sm:$0xff]  ;;  %vm130_vm1 = vcmask 261120   ;;  %v93_v8 = vld [vmem:[#allocation5] sm:$0xff]  ;;  %vm251_vm2 = vcmask 130048   ;;  %vm374_vm3 = vcmask 1043456  }
  0x36   :  { %2139 = vmatprep.subr.bf16.mxu0 %v2515_v0  ;;  %2141 = vmatprep.mubr.msk.bf16.mxu0 %vm2516_vm0, %v2515_v0  ;;  %v2329_v5 = vld [vmem:[%s3017_s3 + $0x8] sm:$0xff]   ;;  %v109_v6 = vpack.c.bf16 %v2609_v4, %v2607_v3  ;;  %v2330_v7 = vld [vmem:[%s3017_s3] sm:$0xff]   ;;  %v94_v9 = vld [vmem:[#allocation5 + $0x8] sm:$0xff]  ;;  %v2632_v12 = vshrl.u32 %v96_v11, 7  ;;  %v99_v38 = vand.u32 127, %v96_v11  ;;  %vm344_vm5 = vcmask 64512  }
  0x37   :  { %2124 = vmatpush3.bf16.msra.mxu1 %v2327_v1  ;;  %v2625_v10 = vpack.c.bf16 %v94_v9, %v93_v8  ;;  %v2635_v14 = vld [vmem:[#allocation8] sm:$0xff]  ;;  %s2517_s23 = smov 112   ;;  %vm936_vm7 = vcmask 523264  }
  0x38   :  { %2125 = vmatprep.subr.bf16.mxu1 %v2515_v0  ;;  %v116_v13 = vsub.s32 0, %v2632_v12  ;;  %v181_v26 = vsub.s32 1, %v2632_v12  ;;  %vm2665_vm4 = vcmp.lt.s32.totalorder %v99_v38, %v2632_v12  ;;  %vm101_vm6 = vcmp.gt.s32.totalorder %v2632_v12, 0 }
  0x3a   :  { %v117_v15 = vrot.slane %v2635_v14, %v116_v13  ;;  %v182_v27 = vrot.slane %v2635_v14, %v181_v26 }
  0x3b   :  { %2126 = vmatpush3.bf16.msra.mxu1 %v2328_v2 }
  0x3c   :  { %2131 = vmatprep.subr.bf16.mxu1 %v2515_v0 }
  0x3e   :  { %2128 = vmatmul.mubr.msk.bf16.vlgmr.msra.gmra.mxu1 %vm130_vm1, %v109_v6  ;;  %v2681_v6 = vsel %vm101_vm6, 1.0, %v2515_v0 }
  0x3f   :  { %2132 = vmatpush3.bf16.msra.mxu1 %v2329_v5  ;;  %2135 = vmatprep.mubr.msk.bf16.mxu1 %vm2516_vm0, %v2515_v0 }
  0x40   :  { %2133 = vmatprep.subr.bf16.mxu1 %v2515_v0 }
  0x43   :  { %2134 = vmatpush3.bf16.msra.mxu1 %v2330_v7 }
  0x44   :  { %2145 = vmatprep.subr.bf16.mxu1 %v2515_v0 }
  0x46   :  { %2136 = vmatmul.mubr.msk.bf16.vlgmr.msra.gmra.mxu1 %vm130_vm1, %v2625_v10 }
  0x47   :  { %2147 = vmatprep.mubr.msk.bf16.mxu1 %vm2516_vm0, %v2515_v0 }
  0xfe   :  { %v168_v16 = vpop.f32.mrf.mxu1 }
  0xff   :  { %v169_v17 = vadd.f32 %v168_v16, %v117_v15 }
 0x100   :  { %v2129_v18 = vpop.f32.mrf.mxu1 }
 0x101   :  { %v2047_v19 = vpack.c.bf16 %v169_v17, %v169_v17 }
 0x102   :  { %v171_v20 = vpop.f32.mrf.mxu1 }
 0x103   :  { %v172_v21 = vadd.f32 %v171_v20, %v117_v15  ;;  %v253_v22 = vsel %vm251_vm2, %v2047_v19, 0 }
 0x104   :  { %v2130_v23 = vpop.f32.mrf.mxu1  ;;  %2140 = vmatpush3.bf16.xpose.msra.mxu0 %v253_v22 }
 0x105   :  { %v2048_v24 = vpack.c.bf16 %v172_v21, %v172_v21  ;;  %2151 = vmatprep.subr.bf16.mxu0 %v2515_v0 }
 0x106   :  { %v232_v28 = vpop.f32.mrf.mxu1 }
 0x107   :  { %v296_v25 = vsel %vm251_vm2, %v2048_v24, 0  ;;  %v233_v29 = vadd.f32 %v232_v28, %v182_v27 }
 0x108   :  { %2146 = vmatpush3.bf16.xpose.msra.mxu1 %v296_v25  ;;  %v2137_v30 = vpop.f32.mrf.mxu1 }
 0x109   :  { %2157 = vmatprep.subr.bf16.mxu1 %v2515_v0  ;;  %v2654_v31 = vpack.c.bf16 %v233_v29, %v233_v29 }
 0x10a   :  { %v235_v32 = vpop.f32.mrf.mxu1 }
 0x10b   :  { %2142 = vmatmul.mubr.msk.bf16.vlgmr.msra.gmra.mxu0 %vm251_vm2, %v2047_v19  ;;  %v376_v33 = vsel %vm374_vm3, %v2654_v31, 0  ;;  %v236_v34 = vadd.f32 %v235_v32, %v182_v27 }
 0x10c   :  { %2153 = vmatprep.mubr.msk.bf16.mxu0 %vm2516_vm0, %v2515_v0  ;;  %v2138_v35 = vpop.f32.mrf.mxu1  ;;  %2152 = vmatpush3.bf16.msra.mxu0 %v376_v33 }
 0x10d   :  { %v2658_v36 = vpack.c.bf16 %v236_v34, %v236_v34  ;;  %2163 = vmatprep.subr.bf16.mxu0 %v2515_v0 }
 0x10f   :  { %2148 = vmatmul.mubr.msk.bf16.vlgmr.msra.gmra.mxu1 %vm251_vm2, %v2048_v24  ;;  %v422_v37 = vsel %vm374_vm3, %v2658_v36, 0 }
 0x110   :  { %2159 = vmatprep.mubr.msk.bf16.mxu1 %vm2516_vm0, %v2515_v0  ;;  %2158 = vmatpush3.bf16.msra.mxu1 %v422_v37 }
 0x111   :  { %2169 = vmatprep.subr.bf16.mxu1 %v2515_v0 }
 0x1cb   :  { %v289_v39 = vpop.f32.mrf.mxu0 }
 0x1cc   :  { %v338_v41 = vmul.f32 0.25, %v289_v39 }
 0x1cd   :  { %v2143_v42 = vpop.f32.mrf.mxu0 }
 0x1ce   :  { %v342_v43 = vsel %vm2665_vm4, %v338_v41, -1e+32 }
 0x1cf   :  { %v292_v44 = vpop.f32.mrf.mxu0  ;;  %v332_v45 = vpop.f32.mrf.mxu1  ;;  %v345_v46 = vsel %vm344_vm5, %v342_v43, -inf }
 0x1d0   :  { %v339_v47 = vmul.f32 0.25, %v332_v45  ;;  %346 = vmax.xlane.f32.xlu0 %v345_v46 }
 0x1d1   :  { %v2144_v48 = vpop.f32.mrf.mxu0  ;;  %v2149_v49 = vpop.f32.mrf.mxu1 }
 0x1d2   :  { %v343_v50 = vsel %vm2665_vm4, %v339_v47, -1e+32 }
 0x1d3   :  { %v335_v51 = vpop.f32.mrf.mxu1  ;;  %v348_v52 = vsel %vm344_vm5, %v343_v50, -inf }
 0x1d4   :  { %349 = vmax.xlane.f32.xlu0 %v348_v52 }
 0x1d5   :  { %v2150_v53 = vpop.f32.mrf.mxu1 }
 0x1ea   :  { %465 = vrot.lane.b32.xlu0 %v2047_v19, %s2517_s23 }
 0x259   :  { %v347_v54 = vpop.xlane.xlu0 %346 }
 0x25a   :  { %v351_v55 = vsub.f32 %v342_v43, %v347_v54 }
 0x25c   :  { %v353_v56 = vmul.f32 1.442695, %v351_v55 }
 0x25d   :  { %v350_v57 = vpop.xlane.xlu0 %349 }
 0x25e   :  { %2351 = vpow2.f32 %v353_v56  ;;  %v352_v58 = vsub.f32 %v343_v50, %v350_v57 }
 0x260   :  { %v355_v59 = vmul.f32 1.442695, %v352_v58 }
 0x261   :  { %v466_v11 = vpop.permute.xlu0 %465 }
 0x262   :  { %2353 = vpow2.f32 %v355_v59  ;;  %v468_v17 = vsel %vm251_vm2, %v466_v11, 0 }
 0x26b   :  { %v2352_v60 = vpop.eup %2351 }
 0x26c   :  { %v357_v61 = vsel %vm344_vm5, %v2352_v60, 0.0 }
 0x26d   :  { %358 = vadd.xlane.f32.xlu1 %v357_v61 }
 0x26f   :  { %v2354_v62 = vpop.eup %2353 }
 0x270   :  { %v360_v63 = vsel %vm344_vm5, %v2354_v62, 0.0 }
 0x271   :  { %361 = vadd.xlane.f32.xlu1 %v360_v63 }
 0x282   :  { %510 = vrot.lane.b32.xlu1 %v2048_v24, %s2517_s23 }
 0x2f6   :  { %v359_v1 = vpop.xlane.xlu1 %358 }
 0x2f7   :  { %2355 = vrcp.f32 %v359_v1 }
 0x2fa   :  { %v362_v2 = vpop.xlane.xlu1 %361 }
 0x2fb   :  { %2357 = vrcp.f32 %v362_v2 }
 0x2fe   :  { %v511_v19 = vpop.permute.xlu1 %510 }
 0x2ff   :  { %v513_v21 = vsel %vm251_vm2, %v511_v19, 0 }
 0x304   :  { %v2356_v5 = vpop.eup %2355 }
 0x305   :  { %v365_v7 = vmul.f32 %v2356_v5, %v2352_v60 }
 0x307   :  { %v367_v8 = vmul.f32 %v2681_v6, %v365_v7 }
 0x308   :  { %v2358_v9 = vpop.eup %2357 }
 0x309   :  { %v369_v15 = vpack.c.bf16 %v367_v8, %v367_v8  ;;  %v366_v16 = vmul.f32 %v2358_v9, %v2354_v62 }
 0x30b   :  { %2154 = vmatmul.mubr.msk.bf16.vlgmr.msra.gmra.mxu0 %vm344_vm5, %v369_v15  ;;  %v368_v18 = vmul.f32 %v2681_v6, %v366_v16  ;;  %v2332_v16 = vld [vmem:[%s3018_s4 + $0x8] sm:$0xff]  }
 0x30c   :  { %2164 = vmatpush3.bf16.xpose.msra.mxu0 %v468_v17  ;;  %2165 = vmatprep.mubr.msk.bf16.mxu0 %vm2516_vm0, %v2515_v0 }
 0x30d   :  { %v370_v20 = vpack.c.bf16 %v368_v18, %v368_v18  ;;  %2175 = vmatprep.subr.bf16.mxu0 %v2515_v0 }
 0x30f   :  { %2160 = vmatmul.mubr.msk.bf16.vlgmr.msra.gmra.mxu1 %vm344_vm5, %v370_v20 }
 0x310   :  { %2170 = vmatpush3.bf16.xpose.msra.mxu1 %v513_v21  ;;  %2171 = vmatprep.mubr.msk.bf16.mxu1 %vm2516_vm0, %v2515_v0 }
 0x311   :  { %2181 = vmatprep.subr.bf16.mxu1 %v2515_v0 }
 0x313   :  { %2166 = vmatmul.mubr.msk.bf16.vlgmr.msra.gmra.mxu0 %vm251_vm2, %v466_v11  ;;  %v2331_v11 = vld [vmem:[%s3018_s4] sm:$0xff]  }
 0x314   :  { %2177 = vmatprep.mubr.msk.bf16.mxu0 %vm2516_vm0, %v2515_v0 }
 0x317   :  { %2172 = vmatmul.mubr.msk.bf16.vlgmr.msra.gmra.mxu1 %vm251_vm2, %v511_v19 }
 0x318   :  { %2183 = vmatprep.mubr.msk.bf16.mxu1 %vm2516_vm0, %v2515_v0 }
 0x3cb   :  { %v2701_v22 = vpop.f32.mrf.mxu0 }
 0x3cd   :  { %v2155_v23 = vpop.f32.mrf.mxu0 }
 0x3cf   :  { %v415_v24 = vpop.f32.mrf.mxu0  ;;  %v2703_v25 = vpop.f32.mrf.mxu1 }
 0x3d0   :  { %v464_v27 = vpack.c.bf16 %v2703_v25, %v2701_v22 }
 0x3d1   :  { %v2156_v28 = vpop.f32.mrf.mxu0  ;;  %v2161_v29 = vpop.f32.mrf.mxu1 }
 0x3d3   :  { %v461_v30 = vpop.f32.mrf.mxu1  ;;  %v504_v32 = vpop.f32.mrf.mxu0 }
 0x3d4   :  { %v555_v33 = vmul.f32 0.25, %v504_v32  ;;  %v784_v32 = vsub.s32 2, %v2632_v12 }
 0x3d5   :  { %v2162_v34 = vpop.f32.mrf.mxu1  ;;  %v2167_v35 = vpop.f32.mrf.mxu0 }
 0x3d6   :  { %v557_v37 = vsel %vm2665_vm4, %v555_v33, -1e+32  ;;  %v785_v33 = vrot.slane %v2635_v14, %v784_v32 }
 0x3d7   :  { %v507_v38 = vpop.f32.mrf.mxu0  ;;  %v549_v39 = vpop.f32.mrf.mxu1  ;;  %v559_v41 = vsel %vm344_vm5, %v557_v37, -inf }
 0x3d8   :  { %v556_v42 = vmul.f32 0.25, %v549_v39  ;;  %560 = vmax.xlane.f32.xlu1 %v559_v41 }
 0x3d9   :  { %v2168_v43 = vpop.f32.mrf.mxu0  ;;  %v2173_v44 = vpop.f32.mrf.mxu1 }
 0x3da   :  { %v558_v45 = vsel %vm2665_vm4, %v556_v42, -1e+32 }
 0x3db   :  { %v552_v46 = vpop.f32.mrf.mxu1  ;;  %v562_v47 = vsel %vm344_vm5, %v558_v45, -inf }
 0x3dc   :  { %563 = vmax.xlane.f32.xlu0 %v562_v47 }
 0x3dd   :  { %v2174_v48 = vpop.f32.mrf.mxu1 }
 0x461   :  { %v561_v49 = vpop.xlane.xlu1 %560 }
 0x462   :  { %v565_v50 = vsub.f32 %v557_v37, %v561_v49 }
 0x464   :  { %v567_v51 = vmul.f32 1.442695, %v565_v50 }
 0x465   :  { %v564_v52 = vpop.xlane.xlu0 %563 }
 0x466   :  { %2359 = vpow2.f32 %v567_v51  ;;  %v566_v53 = vsub.f32 %v558_v45, %v564_v52 }
 0x468   :  { %v569_v54 = vmul.f32 1.442695, %v566_v53 }
 0x46a   :  { %2361 = vpow2.f32 %v569_v54 }
 0x473   :  { %v2360_v55 = vpop.eup %2359 }
 0x474   :  { %v571_v56 = vsel %vm344_vm5, %v2360_v55, 0.0 }
 0x475   :  { %572 = vadd.xlane.f32.xlu0 %v571_v56 }
 0x477   :  { %v2362_v57 = vpop.eup %2361 }
 0x478   :  { %v574_v58 = vsel %vm344_vm5, %v2362_v57, 0.0 }
 0x479   :  { %575 = vadd.xlane.f32.xlu1 %v574_v58  ;;  %v2335_v58 = vld [vmem:[%s3020_s6 + $0x18] sm:$0xff]  }
 0x48a   :  { %633 = vrot.lane.b32.xlu1 %v2658_v36, %s2517_s23 }
 0x48b   :  { %585 = vrot.lane.b32.xlu0 %v2654_v31, %s2517_s23 }
 0x4fe   :  { %v573_v59 = vpop.xlane.xlu0 %572 }
 0x4ff   :  { %2363 = vrcp.f32 %v573_v59 }
 0x502   :  { %v576_v60 = vpop.xlane.xlu1 %575  ;;  %v586_v61 = vpop.permute.xlu0 %585 }
 0x503   :  { %2365 = vrcp.f32 %v576_v60  ;;  %v591_v62 = vsel %vm374_vm3, %v586_v61, 0 }
 0x504   :  { %2176 = vmatpush3.bf16.msra.mxu0 %v591_v62 }
 0x505   :  { %2187 = vmatprep.subr.bf16.mxu0 %v2515_v0 }
 0x506   :  { %v634_v63 = vpop.permute.xlu1 %633 }
 0x507   :  { %v639_v1 = vsel %vm374_vm3, %v634_v63, 0 }
 0x508   :  { %2182 = vmatpush3.bf16.msra.mxu1 %v639_v1 }
 0x509   :  { %2193 = vmatprep.subr.bf16.mxu1 %v2515_v0 }
 0x50c   :  { %v2364_v36 = vpop.eup %2363 }
 0x50d   :  { %v579_v2 = vmul.f32 %v2364_v36, %v2360_v55  ;;  %v819_v36 = vsub.s32 3, %v2632_v12 }
 0x50f   :  { %v581_v31 = vmul.f32 %v2681_v6, %v579_v2 }
 0x510   :  { %v2366_v5 = vpop.eup %2365 }
 0x511   :  { %v583_v7 = vpack.c.bf16 %v581_v31, %v581_v31  ;;  %v580_v8 = vmul.f32 %v2366_v5, %v2362_v57  ;;  %v2333_v57 = vld [vmem:[#allocation7 + $0x8] sm:$0xff]   ;;  %v820_v5 = vrot.slane %v2635_v14, %v819_v36 }
 0x513   :  { %2178 = vmatmul.mubr.msk.bf16.vlgmr.msra.gmra.mxu0 %vm344_vm5, %v583_v7  ;;  %v582_v9 = vmul.f32 %v2681_v6, %v580_v8  ;;  %v825_v7 = vsub.s32 4, %v2632_v12 }
 0x514   :  { %2189 = vmatprep.mubr.msk.bf16.mxu0 %vm2516_vm0, %v2515_v0  ;;  %2188 = vmatpush3.bf16.msra.mxu0 %v2332_v16 }
 0x515   :  { %v584_v15 = vpack.c.bf16 %v582_v9, %v582_v9  ;;  %2199 = vmatprep.subr.bf16.mxu0 %v2515_v0 }
 0x517   :  { %2184 = vmatmul.mubr.msk.bf16.vlgmr.msra.gmra.mxu1 %vm344_vm5, %v584_v15  ;;  %v826_v15 = vrot.slane %v2635_v14, %v825_v7 }
 0x518   :  { %2194 = vmatpush3.bf16.msra.mxu1 %v2331_v11  ;;  %2195 = vmatprep.mubr.msk.bf16.mxu1 %vm2516_vm0, %v2515_v0 }
 0x519   :  { %2207 = vmatprep.subr.bf16.mxu1 %v2515_v0 }
 0x51f   :  { %2196 = vmatmul.mubr.msk.bf16.vlgmr.msra.gmra.mxu1 %vm251_vm2, %v464_v27 }
 0x520   :  { %2215 = vmatprep.mubr.msk.bf16.mxu1 %vm2516_vm0, %v2515_v0  ;;  %2208 = vmatpush3.bf16.msra.mxu1 %v2335_v58  ;;  %v2339_v58 = vld [vmem:[%s3016_s2 + $0x18] sm:$0xff]  }
 0x521   :  { %2209 = vmatprep.subr.bf16.mxu1 %v2515_v0 }
 0x5d3   :  { %v627_v17 = vpop.f32.mrf.mxu0 }
 0x5d5   :  { %v2179_v18 = vpop.f32.mrf.mxu0 }
 0x5d7   :  { %v630_v19 = vpop.f32.mrf.mxu0  ;;  %v675_v20 = vpop.f32.mrf.mxu1 }
 0x5d8   :  { %v681_v21 = vpack.c.bf16 %v675_v20, %v627_v17  ;;  %v2336_v20 = vld [vmem:[%s3020_s6 + $0x10] sm:$0xff]  }
 0x5d9   :  { %v2180_v23 = vpop.f32.mrf.mxu0  ;;  %v2185_v24 = vpop.f32.mrf.mxu1  ;;  %2210 = vmatpush3.bf16.msra.mxu1 %v2336_v20 }
 0x5da   :  { %2190 = vmatmul.mubr.msk.bf16.vlgmr.msra.gmra.mxu0 %vm251_vm2, %v681_v21  ;;  %2211 = vmatprep.subr.bf16.mxu1 %v2515_v0  ;;  %v2337_v21 = vld [vmem:[%s3020_s6 + $0x8] sm:$0xff]   ;;  %v2338_v23 = vld [vmem:[%s3020_s6] sm:$0xff]  }
 0x5db   :  { %v678_v22 = vpop.f32.mrf.mxu1  ;;  %2203 = vmatprep.mubr.msk.bf16.mxu0 %vm2516_vm0, %v2515_v0  ;;  %2200 = vmatpush3.bf16.msra.mxu0 %v2333_v57  ;;  %v1986_v24 = vld [vmem:[%s3022_s8] ss:$0 sm:$0xff] }
 0x5dc   :  { %2201 = vmatprep.subr.bf16.mxu0 %v2515_v0 }
 0x5dd   :  { %v2186_v25 = vpop.f32.mrf.mxu1  ;;  %2212 = vmatpush3.bf16.msra.mxu1 %v2337_v21 }
 0x5de   :  { %2213 = vmatprep.subr.bf16.mxu1 %v2515_v0 }
 0x5df   :  { %v775_v27 = vpop.f32.mrf.mxu1 }
 0x5e1   :  { %v2197_v28 = vpop.f32.mrf.mxu1  ;;  %2214 = vmatpush3.bf16.msra.mxu1 %v2338_v23  ;;  %v2341_v23 = vld [vmem:[%s3017_s3 + $0x18] sm:$0xff]  }
 0x5e2   :  { %2235 = vmatprep.subr.bf16.mxu1 %v2515_v0 }
 0x5e3   :  { %v778_v29 = vpop.f32.mrf.mxu1 }
 0x5e5   :  { %v2198_v30 = vpop.f32.mrf.mxu1 }
 0x69a   :  { %v725_v34 = vpop.f32.mrf.mxu0 }
 0x69b   :  { %v776_v35 = vadd.f32 %v775_v27, %v725_v34 }
 0x69c   :  { %v2191_v37 = vpop.f32.mrf.mxu0 }
 0x69d   :  { %v786_v38 = vadd.f32 %v785_v33, %v776_v35  ;;  %v910_v37 = vsub.s32 5, %v2632_v12 }
 0x69e   :  { %v728_v39 = vpop.f32.mrf.mxu0 }
 0x69f   :  { %v779_v41 = vadd.f32 %v778_v29, %v728_v39  ;;  %v788_v42 = vadd.f32 %v786_v38, %v2607_v3  ;;  %v911_v38 = vrot.slane %v2635_v14, %v910_v37 }
 0x6a0   :  { %v2192_v43 = vpop.f32.mrf.mxu0 }
 0x6a1   :  { %v787_v44 = vadd.f32 %v785_v33, %v779_v41  ;;  %v790_v45 = vsel %vm130_vm1, %v788_v42, 0.0 }
 0x6a2   :  { %791 = vadd.xlane.f32.xlu1 %v790_v45 }
 0x6a3   :  { %v789_v46 = vadd.f32 %v787_v44, %v2609_v4  ;;  %v2334_v4 = vld [vmem:[#allocation7] sm:$0xff]  }
 0x6a4   :  { %2202 = vmatpush3.bf16.msra.mxu0 %v2334_v4 }
 0x6a5   :  { %v793_v47 = vsel %vm130_vm1, %v789_v46, 0.0  ;;  %2219 = vmatprep.subr.bf16.mxu0 %v2515_v0 }
 0x6a6   :  { %794 = vadd.xlane.f32.xlu0 %v793_v47 }
 0x72b   :  { %v792_v48 = vpop.xlane.xlu1 %791 }
 0x72c   :  { %v797_v49 = vmul.f32 0.03125, %v792_v48 }
 0x72e   :  { %v799_v50 = vsub.f32 %v788_v42, %v797_v49 }
 0x72f   :  { %v795_v51 = vpop.xlane.xlu0 %794 }
 0x730   :  { %v798_v52 = vmul.f32 0.03125, %v795_v51  ;;  %v801_v53 = vmul.f32 %v799_v50, %v799_v50 }
 0x732   :  { %v800_v54 = vsub.f32 %v789_v46, %v798_v52  ;;  %v803_v55 = vsel %vm130_vm1, %v801_v53, 0.0 }
 0x733   :  { %804 = vadd.xlane.f32.xlu0 %v803_v55 }
 0x734   :  { %v802_v3 = vmul.f32 %v800_v54, %v800_v54 }
 0x736   :  { %v806_v56 = vsel %vm130_vm1, %v802_v3, 0.0 }
 0x737   :  { %807 = vadd.xlane.f32.xlu1 %v806_v56 }
 0x7bc   :  { %v805_v59 = vpop.xlane.xlu0 %804 }
 0x7bd   :  { %v809_v60 = vmul.f32 0.03125, %v805_v59  ;;  %v2340_v59 = vld [vmem:[%s3016_s2 + $0x10] sm:$0xff]  }
 0x7bf   :  { %v811_v61 = vadd.f32 1e-05, %v809_v60 }
 0x7c0   :  { %v808_v62 = vpop.xlane.xlu1 %807 }
 0x7c1   :  { %2367 = vrsqrt.f32 %v811_v61  ;;  %v810_v63 = vmul.f32 0.03125, %v808_v62 }
 0x7c3   :  { %v812_v1 = vadd.f32 1e-05, %v810_v63 }
 0x7c5   :  { %2369 = vrsqrt.f32 %v812_v1 }
 0x7ce   :  { %v2368_v2 = vpop.eup %2367 }
 0x7cf   :  { %v815_v31 = vmul.f32 %v2368_v2, %v799_v50 }
 0x7d1   :  { %v821_v11 = vmul.f32 %v820_v5, %v815_v31  ;;  %v1011_v31 = vsub.s32 6, %v2632_v12 }
 0x7d2   :  { %v2370_v8 = vpop.eup %2369 }
 0x7d3   :  { %v816_v9 = vmul.f32 %v2370_v8, %v800_v54  ;;  %v827_v17 = vadd.f32 %v826_v15, %v821_v11  ;;  %v1017_v11 = vsub.s32 7, %v2632_v12 }
 0x7d5   :  { %v822_v16 = vmul.f32 %v820_v5, %v816_v9  ;;  %v1012_v9 = vrot.slane %v2635_v14, %v1011_v31 }
 0x7d7   :  { %v828_v18 = vadd.f32 %v826_v15, %v822_v16 }
 0x7d9   :  { %v829_v19 = vpack.c.bf16 %v828_v18, %v827_v17 }
 0x7db   :  { %2204 = vmatmul.mubr.msk.bf16.vlgmr.msra.gmra.mxu0 %vm130_vm1, %v829_v19 }
 0x7dc   :  { %2223 = vmatprep.mubr.msk.bf16.mxu0 %vm2516_vm0, %v2515_v0  ;;  %2220 = vmatpush3.bf16.msra.mxu0 %v2339_v58 }
 0x7dd   :  { %2221 = vmatprep.subr.bf16.mxu0 %v2515_v0 }
 0x7e0   :  { %2222 = vmatpush3.bf16.msra.mxu0 %v2340_v59 }
 0x7e1   :  { %2227 = vmatprep.subr.bf16.mxu0 %v2515_v0 }
 0x89b   :  { %v890_v22 = vpop.f32.mrf.mxu0 }
 0x89c   :  { %v891_v27 = vadd.f32 %v1986_v24, %v890_v22  ;;  %v2838_v22 = vld [vmem:[#allocation8 + $0x8] sm:$0xff] }
 0x89d   :  { %v2205_v25 = vpop.f32.mrf.mxu0 }
 0x89e   :  { %v897_v33 = vmax.f32 %v891_v27, 0.0  ;;  %v1037_v25 = vrot.slane %v2838_v22, %v116_v13  ;;  %v1102_v13 = vrot.slane %v2838_v22, %v181_v26 }
 0x89f   :  { %v893_v28 = vpop.f32.mrf.mxu0 }
 0x8a0   :  { %v894_v29 = vadd.f32 %v1986_v24, %v893_v28 }
 0x8a1   :  { %v2206_v30 = vpop.f32.mrf.mxu0 }
 0x8a2   :  { %v898_v34 = vmax.f32 %v894_v29, 0.0 }
 0x8a4   :  { %v899_v35 = vpack.c.bf16 %v898_v34, %v897_v33 }
 0x8a6   :  { %2216 = vmatmul.mubr.msk.bf16.vlgmr.msra.gmra.mxu1 %vm936_vm7, %v899_v35 }
 0x8a7   :  { %2237 = vmatprep.mubr.msk.bf16.mxu1 %vm2516_vm0, %v2515_v0 }
 0x966   :  { %v974_v39 = vpop.f32.mrf.mxu1 }
 0x967   :  { %v975_v41 = vadd.f32 %v974_v39, %v911_v38 }
 0x968   :  { %v2217_v42 = vpop.f32.mrf.mxu1 }
 0x969   :  { %v981_v43 = vadd.f32 %v975_v41, %v827_v17 }
 0x96a   :  { %v977_v44 = vpop.f32.mrf.mxu1 }
 0x96b   :  { %v978_v45 = vadd.f32 %v977_v44, %v911_v38  ;;  %v983_v46 = vsel %vm130_vm1, %v981_v43, 0.0 }
 0x96c   :  { %984 = vadd.xlane.f32.xlu0 %v983_v46  ;;  %v2218_v47 = vpop.f32.mrf.mxu1 }
 0x96d   :  { %v982_v48 = vadd.f32 %v978_v45, %v828_v18  ;;  %v1018_v18 = vrot.slane %v2635_v14, %v1017_v11  ;;  %v2342_v14 = vld [vmem:[%s3017_s3 + $0x10] sm:$0xff]  }
 0x96f   :  { %v986_v49 = vsel %vm130_vm1, %v982_v48, 0.0 }
 0x970   :  { %987 = vadd.xlane.f32.xlu1 %v986_v49 }
 0x9f5   :  { %v985_v50 = vpop.xlane.xlu0 %984 }
 0x9f6   :  { %v989_v51 = vmul.f32 0.03125, %v985_v50 }
 0x9f8   :  { %v991_v52 = vsub.f32 %v981_v43, %v989_v51 }
 0x9f9   :  { %v988_v53 = vpop.xlane.xlu1 %987 }
 0x9fa   :  { %v990_v54 = vmul.f32 0.03125, %v988_v53  ;;  %v993_v55 = vmul.f32 %v991_v52, %v991_v52 }
 0x9fc   :  { %v992_v3 = vsub.f32 %v982_v48, %v990_v54  ;;  %v995_v56 = vsel %vm130_vm1, %v993_v55, 0.0 }
 0x9fd   :  { %996 = vadd.xlane.f32.xlu0 %v995_v56 }
 0x9fe   :  { %v994_v57 = vmul.f32 %v992_v3, %v992_v3 }
 0xa00   :  { %v998_v4 = vsel %vm130_vm1, %v994_v57, 0.0 }
 0xa01   :  { %999 = vadd.xlane.f32.xlu1 %v998_v4 }
 0xa86   :  { %v997_v60 = vpop.xlane.xlu0 %996 }
 0xa87   :  { %v1001_v61 = vmul.f32 0.03125, %v997_v60 }
 0xa89   :  { %v1003_v62 = vadd.f32 1e-05, %v1001_v61 }
 0xa8a   :  { %v1000_v63 = vpop.xlane.xlu1 %999 }
 0xa8b   :  { %2371 = vrsqrt.f32 %v1003_v62  ;;  %v1002_v1 = vmul.f32 0.03125, %v1000_v63 }
 0xa8d   :  { %v1004_v2 = vadd.f32 1e-05, %v1002_v1 }
 0xa8f   :  { %2373 = vrsqrt.f32 %v1004_v2 }
 0xa98   :  { %v2372_v5 = vpop.eup %2371 }
 0xa99   :  { %v1007_v8 = vmul.f32 %v2372_v5, %v991_v52 }
 0xa9b   :  { %v1013_v17 = vmul.f32 %v1012_v9, %v1007_v8 }
 0xa9c   :  { %v2374_v15 = vpop.eup %2373 }
 0xa9d   :  { %v1008_v16 = vmul.f32 %v2374_v15, %v992_v3  ;;  %v2817_v20 = vadd.f32 %v1018_v18, %v1013_v17 }
 0xa9f   :  { %v1014_v19 = vmul.f32 %v1012_v9, %v1008_v16 }
 0xaa1   :  { %v2819_v21 = vadd.f32 %v1018_v18, %v1014_v19 }
 0xaa3   :  { %v1028_v24 = vpack.c.bf16 %v2819_v21, %v2817_v20 }
 0xaa5   :  { %2224 = vmatmul.mubr.msk.bf16.vlgmr.msra.gmra.mxu0 %vm130_vm1, %v1028_v24 }
 0xaa6   :  { %2228 = vmatpush3.bf16.msra.mxu0 %v2341_v23  ;;  %2231 = vmatprep.mubr.msk.bf16.mxu0 %vm2516_vm0, %v2515_v0 }
 0xaa7   :  { %2229 = vmatprep.subr.bf16.mxu0 %v2515_v0 }
 0xaaa   :  { %2230 = vmatpush3.bf16.msra.mxu0 %v2342_v14 }
 0xaab   :  { %2241 = vmatprep.subr.bf16.mxu0 %v2515_v0 }
 0xaad   :  { %2232 = vmatmul.mubr.msk.bf16.vlgmr.msra.gmra.mxu0 %vm130_vm1, %v2625_v10 }
 0xaae   :  { %2243 = vmatprep.mubr.msk.bf16.mxu0 %vm2516_vm0, %v2515_v0 }
 0xb65   :  { %v1087_v27 = vpop.f32.mrf.mxu0 }
 0xb66   :  { %v1088_v28 = vadd.f32 %v1087_v27, %v1037_v25 }
 0xb67   :  { %v2225_v29 = vpop.f32.mrf.mxu0 }
 0xb68   :  { %v2051_v30 = vpack.c.bf16 %v1088_v28, %v1088_v28 }
 0xb69   :  { %v1090_v33 = vpop.f32.mrf.mxu0 }
 0xb6a   :  { %v1091_v34 = vadd.f32 %v1090_v33, %v1037_v25  ;;  %v1169_v35 = vsel %vm251_vm2, %v2051_v30, 0 }
 0xb6b   :  { %v2226_v38 = vpop.f32.mrf.mxu0  ;;  %2236 = vmatpush3.bf16.xpose.msra.mxu1 %v1169_v35 }
 0xb6c   :  { %v2052_v10 = vpack.c.bf16 %v1091_v34, %v1091_v34  ;;  %2247 = vmatprep.subr.bf16.mxu1 %v2515_v0 }
 0xb6d   :  { %v1149_v41 = vpop.f32.mrf.mxu0 }
 0xb6e   :  { %v1212_v39 = vsel %vm251_vm2, %v2052_v10, 0  ;;  %v1150_v42 = vadd.f32 %v1149_v41, %v1102_v13 }
 0xb6f   :  { %2242 = vmatpush3.bf16.xpose.msra.mxu0 %v1212_v39  ;;  %v2233_v43 = vpop.f32.mrf.mxu0 }
 0xb70   :  { %2253 = vmatprep.subr.bf16.mxu0 %v2515_v0  ;;  %v2856_v44 = vpack.c.bf16 %v1150_v42, %v1150_v42 }
 0xb71   :  { %v1152_v45 = vpop.f32.mrf.mxu0 }
 0xb72   :  { %2238 = vmatmul.mubr.msk.bf16.vlgmr.msra.gmra.mxu1 %vm251_vm2, %v2051_v30  ;;  %v1290_v46 = vsel %vm374_vm3, %v2856_v44, 0  ;;  %v1153_v47 = vadd.f32 %v1152_v45, %v1102_v13 }
 0xb73   :  { %2249 = vmatprep.mubr.msk.bf16.mxu1 %vm2516_vm0, %v2515_v0  ;;  %v2234_v48 = vpop.f32.mrf.mxu0  ;;  %2248 = vmatpush3.bf16.msra.mxu1 %v1290_v46 }
 0xb74   :  { %v2860_v49 = vpack.c.bf16 %v1153_v47, %v1153_v47  ;;  %2259 = vmatprep.subr.bf16.mxu1 %v2515_v0 }
 0xb76   :  { %2244 = vmatmul.mubr.msk.bf16.vlgmr.msra.gmra.mxu0 %vm251_vm2, %v2052_v10  ;;  %v1336_v50 = vsel %vm374_vm3, %v2860_v49, 0 }
 0xb77   :  { %2255 = vmatprep.mubr.msk.bf16.mxu0 %vm2516_vm0, %v2515_v0  ;;  %2254 = vmatpush3.bf16.msra.mxu0 %v1336_v50 }
 0xb78   :  { %2265 = vmatprep.subr.bf16.mxu0 %v2515_v0 }
 0xc32   :  { %v1205_v26 = vpop.f32.mrf.mxu1 }
 0xc33   :  { %v1254_v51 = vmul.f32 0.25, %v1205_v26 }
 0xc34   :  { %v2239_v52 = vpop.f32.mrf.mxu1 }
 0xc35   :  { %v1256_v53 = vsel %vm2665_vm4, %v1254_v51, -1e+32 }
 0xc36   :  { %v1208_v54 = vpop.f32.mrf.mxu1  ;;  %v1248_v55 = vpop.f32.mrf.mxu0  ;;  %v1258_v3 = vsel %vm344_vm5, %v1256_v53, -inf }
 0xc37   :  { %v1255_v56 = vmul.f32 0.25, %v1248_v55  ;;  %1259 = vmax.xlane.f32.xlu0 %v1258_v3 }
 0xc38   :  { %v2240_v57 = vpop.f32.mrf.mxu1  ;;  %v2245_v4 = vpop.f32.mrf.mxu0 }
 0xc39   :  { %v1257_v58 = vsel %vm2665_vm4, %v1255_v56, -1e+32 }
 0xc3a   :  { %v1251_v59 = vpop.f32.mrf.mxu0  ;;  %v1261_v60 = vsel %vm344_vm5, %v1257_v58, -inf }
 0xc3b   :  { %1262 = vmax.xlane.f32.xlu1 %v1261_v60 }
 0xc3c   :  { %v2246_v61 = vpop.f32.mrf.mxu0 }
 0xcc0   :  { %v1260_v62 = vpop.xlane.xlu0 %1259 }
 0xcc1   :  { %v1264_v63 = vsub.f32 %v1256_v53, %v1260_v62 }
 0xcc3   :  { %v1266_v1 = vmul.f32 1.442695, %v1264_v63 }
 0xcc4   :  { %v1263_v2 = vpop.xlane.xlu1 %1262 }
 0xcc5   :  { %2375 = vpow2.f32 %v1266_v1  ;;  %v1265_v5 = vsub.f32 %v1257_v58, %v1263_v2 }
 0xcc7   :  { %v1268_v8 = vmul.f32 1.442695, %v1265_v5 }
 0xcc9   :  { %2377 = vpow2.f32 %v1268_v8 }
 0xcd2   :  { %v2376_v9 = vpop.eup %2375 }
 0xcd3   :  { %v1270_v15 = vsel %vm344_vm5, %v2376_v9, 0.0 }
 0xcd4   :  { %1271 = vadd.xlane.f32.xlu0 %v1270_v15 }
 0xcd6   :  { %v2378_v16 = vpop.eup %2377 }
 0xcd7   :  { %v1273_v17 = vsel %vm344_vm5, %v2378_v16, 0.0 }
 0xcd8   :  { %1274 = vadd.xlane.f32.xlu1 %v1273_v17 }
 0xce9   :  { %1424 = vrot.lane.b32.xlu1 %v2052_v10, %s2517_s23 }
 0xcea   :  { %1379 = vrot.lane.b32.xlu0 %v2051_v30, %s2517_s23 }
 0xd5d   :  { %v1272_v18 = vpop.xlane.xlu0 %1271 }
 0xd5e   :  { %2379 = vrcp.f32 %v1272_v18 }
 0xd61   :  { %v1275_v19 = vpop.xlane.xlu1 %1274  ;;  %v1380_v27 = vpop.permute.xlu0 %1379 }
 0xd62   :  { %2381 = vrcp.f32 %v1275_v19  ;;  %v1382_v33 = vsel %vm251_vm2, %v1380_v27, 0 }
 0xd65   :  { %v1425_v34 = vpop.permute.xlu1 %1424 }
 0xd66   :  { %v1427_v38 = vsel %vm251_vm2, %v1425_v34, 0 }
 0xd6b   :  { %v2380_v23 = vpop.eup %2379 }
 0xd6c   :  { %v1277_v24 = vmul.f32 %v2380_v23, %v2376_v9 }
 0xd6e   :  { %1280 = vst.msk [vmem:[%s3024_s10] sm:$0xff] %vm344_vm5, %v1277_v24  ;;  %v1282_v14 = vmul.f32 %v2681_v6, %v1277_v24 }
 0xd6f   :  { %v2382_v25 = vpop.eup %2381 }
 0xd70   :  { %v1284_v28 = vpack.c.bf16 %v1282_v14, %v1282_v14  ;;  %v1279_v29 = vmul.f32 %v2382_v25, %v2378_v16 }
 0xd72   :  { %2250 = vmatmul.mubr.msk.bf16.vlgmr.msra.gmra.mxu1 %vm344_vm5, %v1284_v28  ;;  %1281 = vst.msk [vmem:[%s3024_s10 + $0x10] sm:$0xff] %vm344_vm5, %v1279_v29  ;;  %v1283_v30 = vmul.f32 %v2681_v6, %v1279_v29  ;;  %v2343_v29 = vld [vmem:[%s3018_s4 + $0x10] sm:$0xff]  }
 0xd73   :  { %2260 = vmatpush3.bf16.xpose.msra.mxu1 %v1382_v33  ;;  %2261 = vmatprep.mubr.msk.bf16.mxu1 %vm2516_vm0, %v2515_v0 }
 0xd74   :  { %v1285_v35 = vpack.c.bf16 %v1283_v30, %v1283_v30  ;;  %2271 = vmatprep.subr.bf16.mxu1 %v2515_v0 }
 0xd76   :  { %2256 = vmatmul.mubr.msk.bf16.vlgmr.msra.gmra.mxu0 %vm344_vm5, %v1285_v35 }
 0xd77   :  { %2266 = vmatpush3.bf16.xpose.msra.mxu0 %v1427_v38  ;;  %2267 = vmatprep.mubr.msk.bf16.mxu0 %vm2516_vm0, %v2515_v0 }
 0xd78   :  { %2277 = vmatprep.subr.bf16.mxu0 %v2515_v0 }
 0xd7a   :  { %2262 = vmatmul.mubr.msk.bf16.vlgmr.msra.gmra.mxu1 %vm251_vm2, %v1380_v27 }
 0xd7b   :  { %2273 = vmatprep.mubr.msk.bf16.mxu1 %vm2516_vm0, %v2515_v0 }
 0xd7e   :  { %2268 = vmatmul.mubr.msk.bf16.vlgmr.msra.gmra.mxu0 %vm251_vm2, %v1425_v34 }
 0xd7f   :  { %2279 = vmatprep.mubr.msk.bf16.mxu0 %vm2516_vm0, %v2515_v0 }
 0xe32   :  { %v2902_v10 = vpop.f32.mrf.mxu1 }
 0xe34   :  { %v2251_v39 = vpop.f32.mrf.mxu1 }
 0xe36   :  { %v1329_v13 = vpop.f32.mrf.mxu1  ;;  %v2904_v41 = vpop.f32.mrf.mxu0 }
 0xe37   :  { %v1378_v42 = vpack.c.bf16 %v2904_v41, %v2902_v10 }
 0xe38   :  { %v2252_v43 = vpop.f32.mrf.mxu1  ;;  %v2257_v45 = vpop.f32.mrf.mxu0 }
 0xe3a   :  { %v1375_v46 = vpop.f32.mrf.mxu0  ;;  %v1418_v47 = vpop.f32.mrf.mxu1 }
 0xe3b   :  { %v1469_v48 = vmul.f32 0.25, %v1418_v47 }
 0xe3c   :  { %v2258_v50 = vpop.f32.mrf.mxu0  ;;  %v2263_v26 = vpop.f32.mrf.mxu1 }
 0xe3d   :  { %v1471_v51 = vsel %vm2665_vm4, %v1469_v48, -1e+32  ;;  %v1701_v48 = vrot.slane %v2838_v22, %v784_v32 }
 0xe3e   :  { %v1421_v52 = vpop.f32.mrf.mxu1  ;;  %v1463_v53 = vpop.f32.mrf.mxu0  ;;  %v1473_v54 = vsel %vm344_vm5, %v1471_v51, -inf }
 0xe3f   :  { %v1470_v55 = vmul.f32 0.25, %v1463_v53  ;;  %1474 = vmax.xlane.f32.xlu1 %v1473_v54 }
 0xe40   :  { %v2264_v3 = vpop.f32.mrf.mxu1  ;;  %v2269_v56 = vpop.f32.mrf.mxu0 }
 0xe41   :  { %v1472_v57 = vsel %vm2665_vm4, %v1470_v55, -1e+32 }
 0xe42   :  { %v1466_v4 = vpop.f32.mrf.mxu0  ;;  %v1476_v58 = vsel %vm344_vm5, %v1472_v57, -inf }
 0xe43   :  { %1477 = vmax.xlane.f32.xlu0 %v1476_v58 }
 0xe44   :  { %v2270_v59 = vpop.f32.mrf.mxu0 }
 0xec8   :  { %v1475_v60 = vpop.xlane.xlu1 %1474 }
 0xec9   :  { %v1479_v61 = vsub.f32 %v1471_v51, %v1475_v60 }
 0xecb   :  { %v1481_v62 = vmul.f32 1.442695, %v1479_v61 }
 0xecc   :  { %v1478_v63 = vpop.xlane.xlu0 %1477 }
 0xecd   :  { %2383 = vpow2.f32 %v1481_v62  ;;  %v1480_v1 = vsub.f32 %v1472_v57, %v1478_v63 }
 0xecf   :  { %v1483_v2 = vmul.f32 1.442695, %v1480_v1 }
 0xed1   :  { %2385 = vpow2.f32 %v1483_v2 }
 0xeda   :  { %v2384_v5 = vpop.eup %2383 }
 0xedb   :  { %v1485_v8 = vsel %vm344_vm5, %v2384_v5, 0.0 }
 0xedc   :  { %1486 = vadd.xlane.f32.xlu0 %v1485_v8  ;;  %v2345_v8 = vld [vmem:[#allocation7 + $0x18] sm:$0xff]  }
 0xede   :  { %v2386_v9 = vpop.eup %2385 }
 0xedf   :  { %v1488_v40 = vsel %vm344_vm5, %v2386_v9, 0.0 }
 0xee0   :  { %1489 = vadd.xlane.f32.xlu1 %v1488_v40 }
 0xef1   :  { %1549 = vrot.lane.b32.xlu1 %v2860_v49, %s2517_s23 }
 0xef2   :  { %1501 = vrot.lane.b32.xlu0 %v2856_v44, %s2517_s23 }
 0xf65   :  { %v1487_v15 = vpop.xlane.xlu0 %1486 }
 0xf66   :  { %2387 = vrcp.f32 %v1487_v15 }
 0xf69   :  { %v1502_v16 = vpop.permute.xlu0 %1501  ;;  %v1490_v17 = vpop.xlane.xlu1 %1489 }
 0xf6a   :  { %v1507_v18 = vsel %vm374_vm3, %v1502_v16, 0  ;;  %2389 = vrcp.f32 %v1490_v17 }
 0xf6b   :  { %2272 = vmatpush3.bf16.msra.mxu1 %v1507_v18 }
 0xf6c   :  { %2283 = vmatprep.subr.bf16.mxu1 %v2515_v0 }
 0xf6d   :  { %v1550_v19 = vpop.permute.xlu1 %1549 }
 0xf6e   :  { %v1555_v23 = vsel %vm374_vm3, %v1550_v19, 0 }
 0xf6f   :  { %2278 = vmatpush3.bf16.msra.mxu0 %v1555_v23 }
 0xf70   :  { %2289 = vmatprep.subr.bf16.mxu0 %v2515_v0 }
 0xf73   :  { %v2388_v49 = vpop.eup %2387 }
 0xf74   :  { %v1492_v24 = vmul.f32 %v2388_v49, %v2384_v5 }
 0xf76   :  { %1495 = vst.msk [vmem:[%s3024_s10 + $0x8] sm:$0xff] %vm344_vm5, %v1492_v24  ;;  %v1497_v44 = vmul.f32 %v2681_v6, %v1492_v24  ;;  %v1735_v24 = vrot.slane %v2838_v22, %v819_v36  ;;  %v2349_v36 = vld [vmem:[%s3020_s6 + $0x28] sm:$0xff]  }
 0xf77   :  { %v2390_v14 = vpop.eup %2389 }
 0xf78   :  { %v1499_v25 = vpack.c.bf16 %v1497_v44, %v1497_v44  ;;  %v1494_v27 = vmul.f32 %v2390_v14, %v2386_v9  ;;  %v2347_v9 = vld [vmem:[%s3020_s6 + $0x38] sm:$0xff]  }
 0xf7a   :  { %2274 = vmatmul.mubr.msk.bf16.vlgmr.msra.gmra.mxu1 %vm344_vm5, %v1499_v25  ;;  %1496 = vst.msk [vmem:[%s3024_s10 + $0x18] sm:$0xff] %vm344_vm5, %v1494_v27  ;;  %v1498_v28 = vmul.f32 %v2681_v6, %v1494_v27  ;;  %v2344_v6 = vld [vmem:[%s3018_s4 + $0x18] sm:$0xff]   ;;  %v1741_v27 = vrot.slane %v2838_v22, %v825_v7  ;;  %v2350_v7 = vld [vmem:[%s3020_s6 + $0x20] sm:$0xff]  }
 0xf7b   :  { %2285 = vmatprep.mubr.msk.bf16.mxu1 %vm2516_vm0, %v2515_v0  ;;  %2284 = vmatpush3.bf16.msra.mxu1 %v2344_v6 }
 0xf7c   :  { %v1500_v33 = vpack.c.bf16 %v1498_v28, %v1498_v28  ;;  %2295 = vmatprep.subr.bf16.mxu1 %v2515_v0 }
 0xf7e   :  { %2280 = vmatmul.mubr.msk.bf16.vlgmr.msra.gmra.mxu0 %vm344_vm5, %v1500_v33 }
 0xf7f   :  { %2290 = vmatpush3.bf16.msra.mxu0 %v2343_v29  ;;  %2291 = vmatprep.mubr.msk.bf16.mxu0 %vm2516_vm0, %v2515_v0 }
 0xf80   :  { %2303 = vmatprep.subr.bf16.mxu0 %v2515_v0 }
 0xf86   :  { %2292 = vmatmul.mubr.msk.bf16.vlgmr.msra.gmra.mxu0 %vm251_vm2, %v1378_v42 }
 0xf87   :  { %2311 = vmatprep.mubr.msk.bf16.mxu0 %vm2516_vm0, %v2515_v0  ;;  %2304 = vmatpush3.bf16.msra.mxu0 %v2347_v9 }
 0xf88   :  { %2305 = vmatprep.subr.bf16.mxu0 %v2515_v0 }
0x103a   :  { %v1543_v30 = vpop.f32.mrf.mxu1 }
0x103c   :  { %v2275_v34 = vpop.f32.mrf.mxu1 }
0x103d   :  { %v2030_v34 = vld [vmem:[%s3022_s8 + $0x1] ss:$0 sm:$0xff] }
0x103e   :  { %v1546_v35 = vpop.f32.mrf.mxu1  ;;  %v1591_v38 = vpop.f32.mrf.mxu0 }
0x103f   :  { %v1597_v39 = vpack.c.bf16 %v1591_v38, %v1543_v30  ;;  %v2348_v30 = vld [vmem:[%s3020_s6 + $0x30] sm:$0xff]   ;;  %s2518_s6 = smov [#allocation10]  }
0x1040   :  { %v2276_v13 = vpop.f32.mrf.mxu1  ;;  %v2281_v43 = vpop.f32.mrf.mxu0  ;;  %2306 = vmatpush3.bf16.msra.mxu0 %v2348_v30  ;;  %s1945_s8 = sshll.u32 %s2518_s6, 4  ;;  %s1946_s8 = int_to_ptr.vmem [resolvable:$true] %s1945_s8 }
0x1041   :  { %2286 = vmatmul.mubr.msk.bf16.vlgmr.msra.gmra.mxu1 %vm251_vm2, %v1597_v39  ;;  %2307 = vmatprep.subr.bf16.mxu0 %v2515_v0  ;;  %s2479_s2 = scalar_lea.vmem %s1946_s8, 256  ;;  %p2484_p7 = scmp.lt.s32.totalorder %s1946_s8, %s1946_s8 }
0x1042   :  { %v1594_v10 = vpop.f32.mrf.mxu0  ;;  %2299 = vmatprep.mubr.msk.bf16.mxu1 %vm2516_vm0, %v2515_v0  ;;  %2296 = vmatpush3.bf16.msra.mxu1 %v2345_v8  ;;  %v1929_v8 = vrot.slane %v2838_v22, %v1011_v31  ;;  %p2480_p6 = scmp.ne.s32.totalorder %s1946_s8, %s2479_s2  ;;  %p2485_p8 = scmp.lt.s32.totalorder %s2479_s2, %s2479_s2 }
0x1043   :  { %2297 = vmatprep.subr.bf16.mxu1 %v2515_v0 }
0x1044   :  { %v2282_v41 = vpop.f32.mrf.mxu0  ;;  %2308 = vmatpush3.bf16.msra.mxu0 %v2349_v36  ;;  %p2486_p9 = por %p2485_p8, %p2484_p7 }
0x1045   :  { %2309 = vmatprep.subr.bf16.mxu0 %v2515_v0  ;;  %v1829_v0 = vrot.slane %v2838_v22, %v910_v37 }
0x1046   :  { %v1691_v42 = vpop.f32.mrf.mxu0  ;;  %p2487_p10 = pnand %p2486_p9, %p2480_p6 }
0x1048   :  { %v2293_v45 = vpop.f32.mrf.mxu0  ;;  %2310 = vmatpush3.bf16.msra.mxu0 %v2350_v7 }
0x104a   :  { %v1694_v46 = vpop.f32.mrf.mxu0 }
0x104c   :  { %v2294_v47 = vpop.f32.mrf.mxu0 }
0x1101   :  { %v1641_v50 = vpop.f32.mrf.mxu1 }
0x1102   :  { %v1692_v26 = vadd.f32 %v1691_v42, %v1641_v50 }
0x1103   :  { %v2287_v51 = vpop.f32.mrf.mxu1 }
0x1104   :  { %v1702_v52 = vadd.f32 %v1701_v48, %v1692_v26 }
0x1105   :  { %v1644_v53 = vpop.f32.mrf.mxu1 }
0x1106   :  { %v1695_v54 = vadd.f32 %v1694_v46, %v1644_v53  ;;  %v1704_v55 = vadd.f32 %v1702_v52, %v2817_v20 }
0x1107   :  { %v2288_v3 = vpop.f32.mrf.mxu1 }
0x1108   :  { %v1703_v56 = vadd.f32 %v1701_v48, %v1695_v54  ;;  %v1706_v57 = vsel %vm130_vm1, %v1704_v55, 0.0 }
0x1109   :  { %1707 = vadd.xlane.f32.xlu1 %v1706_v57 }
0x110a   :  { %v1705_v4 = vadd.f32 %v1703_v56, %v2819_v21  ;;  %v2346_v21 = vld [vmem:[#allocation7 + $0x10] sm:$0xff]  }
0x110b   :  { %2298 = vmatpush3.bf16.msra.mxu1 %v2346_v21 }
0x110c   :  { %v1709_v58 = vsel %vm130_vm1, %v1705_v4, 0.0 }
0x110d   :  { %1710 = vadd.xlane.f32.xlu0 %v1709_v58 }
0x1192   :  { %v1708_v59 = vpop.xlane.xlu1 %1707 }
0x1193   :  { %v1712_v32 = vmul.f32 0.03125, %v1708_v59 }
0x1195   :  { %v1714_v60 = vsub.f32 %v1704_v55, %v1712_v32 }
0x1196   :  { %v1711_v61 = vpop.xlane.xlu0 %1710 }
0x1197   :  { %v1713_v62 = vmul.f32 0.03125, %v1711_v61  ;;  %v1716_v63 = vmul.f32 %v1714_v60, %v1714_v60 }
0x1199   :  { %v1715_v1 = vsub.f32 %v1705_v4, %v1713_v62  ;;  %v1718_v2 = vsel %vm130_vm1, %v1716_v63, 0.0 }
0x119a   :  { %1719 = vadd.xlane.f32.xlu0 %v1718_v2 }
0x119b   :  { %v1717_v20 = vmul.f32 %v1715_v1, %v1715_v1 }
0x119d   :  { %v1721_v5 = vsel %vm130_vm1, %v1717_v20, 0.0 }
0x119e   :  { %1722 = vadd.xlane.f32.xlu1 %v1721_v5 }
0x1223   :  { %v1720_v40 = vpop.xlane.xlu0 %1719 }
0x1224   :  { %v1724_v15 = vmul.f32 0.03125, %v1720_v40  ;;  %v1935_v40 = vrot.slane %v2838_v22, %v1017_v11 }
0x1226   :  { %v1726_v16 = vadd.f32 1e-05, %v1724_v15 }
0x1227   :  { %v1723_v17 = vpop.xlane.xlu1 %1722 }
0x1228   :  { %2391 = vrsqrt.f32 %v1726_v16  ;;  %v1725_v18 = vmul.f32 0.03125, %v1723_v17 }
0x122a   :  { %v1727_v19 = vadd.f32 1e-05, %v1725_v18 }
0x122c   :  { %2393 = vrsqrt.f32 %v1727_v19 }
0x1235   :  { %v2392_v23 = vpop.eup %2391 }
0x1236   :  { %v1730_v49 = vmul.f32 %v2392_v23, %v1714_v60 }
0x1238   :  { %v1736_v25 = vmul.f32 %v1735_v24, %v1730_v49 }
0x1239   :  { %v2394_v44 = vpop.eup %2393 }
0x123a   :  { %v1731_v14 = vmul.f32 %v2394_v44, %v1715_v1  ;;  %v1742_v29 = vadd.f32 %v1741_v27, %v1736_v25 }
0x123c   :  { %v1737_v28 = vmul.f32 %v1735_v24, %v1731_v14 }
0x123e   :  { %v1743_v33 = vadd.f32 %v1741_v27, %v1737_v28 }
0x1240   :  { %v1744_v6 = vpack.c.bf16 %v1743_v33, %v1742_v29 }
0x1242   :  { %2300 = vmatmul.mubr.msk.bf16.vlgmr.msra.gmra.mxu1 %vm130_vm1, %v1744_v6 }
0x1302   :  { %v1807_v35 = vpop.f32.mrf.mxu1 }
0x1303   :  { %v1808_v39 = vadd.f32 %v2030_v34, %v1807_v35 }
0x1304   :  { %v2301_v38 = vpop.f32.mrf.mxu1 }
0x1305   :  { %v1814_v41 = vmax.f32 %v1808_v39, 0.0 }
0x1306   :  { %v1810_v13 = vpop.f32.mrf.mxu1 }
0x1307   :  { %v1811_v43 = vadd.f32 %v2030_v34, %v1810_v13 }
0x1308   :  { %v2302_v10 = vpop.f32.mrf.mxu1 }
0x1309   :  { %v1815_v42 = vmax.f32 %v1811_v43, 0.0 }
0x130b   :  { %v1816_v45 = vpack.c.bf16 %v1815_v42, %v1814_v41 }
0x130d   :  { %2312 = vmatmul.mubr.msk.bf16.vlgmr.msra.gmra.mxu0 %vm936_vm7, %v1816_v45 }
0x13cd   :  { %v1891_v46 = vpop.f32.mrf.mxu0 }
0x13ce   :  { %v1892_v47 = vadd.f32 %v1891_v46, %v1829_v0 }
0x13cf   :  { %v2313_v48 = vpop.f32.mrf.mxu0 }
0x13d0   :  { %v1898_v50 = vadd.f32 %v1892_v47, %v1742_v29 }
0x13d1   :  { %v1894_v26 = vpop.f32.mrf.mxu0 }
0x13d2   :  { %v1895_v51 = vadd.f32 %v1894_v26, %v1829_v0  ;;  %v1900_v52 = vsel %vm130_vm1, %v1898_v50, 0.0 }
0x13d3   :  { %1901 = vadd.xlane.f32.xlu0 %v1900_v52  ;;  %v2314_v53 = vpop.f32.mrf.mxu0 }
0x13d4   :  { %v1899_v54 = vadd.f32 %v1895_v51, %v1743_v33 }
0x13d6   :  { %v1903_v55 = vsel %vm130_vm1, %v1899_v54, 0.0 }
0x13d7   :  { %1904 = vadd.xlane.f32.xlu1 %v1903_v55 }
0x145c   :  { %v1902_v3 = vpop.xlane.xlu0 %1901 }
0x145d   :  { %v1906_v56 = vmul.f32 0.03125, %v1902_v3 }
0x145f   :  { %v1908_v57 = vsub.f32 %v1898_v50, %v1906_v56 }
0x1460   :  { %v1905_v4 = vpop.xlane.xlu1 %1904 }
0x1461   :  { %v1907_v58 = vmul.f32 0.03125, %v1905_v4  ;;  %v1910_v37 = vmul.f32 %v1908_v57, %v1908_v57 }
0x1463   :  { %v1909_v59 = vsub.f32 %v1899_v54, %v1907_v58  ;;  %v1912_v32 = vsel %vm130_vm1, %v1910_v37, 0.0 }
0x1464   :  { %1913 = vadd.xlane.f32.xlu0 %v1912_v32 }
0x1465   :  { %v1911_v60 = vmul.f32 %v1909_v59, %v1909_v59 }
0x1467   :  { %v1915_v61 = vsel %vm130_vm1, %v1911_v60, 0.0 }
0x1468   :  { %1916 = vadd.xlane.f32.xlu1 %v1915_v61 }
0x14ed   :  { %v1914_v62 = vpop.xlane.xlu0 %1913 }
0x14ee   :  { %v1918_v63 = vmul.f32 0.03125, %v1914_v62 }
0x14f0   :  { %v1920_v1 = vadd.f32 1e-05, %v1918_v63 }
0x14f1   :  { %v1917_v2 = vpop.xlane.xlu1 %1916 }
0x14f2   :  { %2395 = vrsqrt.f32 %v1920_v1  ;;  %v1919_v20 = vmul.f32 0.03125, %v1917_v2 }
0x14f4   :  { %v1921_v5 = vadd.f32 1e-05, %v1919_v20 }
0x14f6   :  { %2397 = vrsqrt.f32 %v1921_v5 }
0x14ff   :  { %v2396_v21 = vpop.eup %2395 }
0x1500   :  { %v1924_v9 = vmul.f32 %v2396_v21, %v1908_v57 }
0x1502   :  { %v1930_v15 = vmul.f32 %v1929_v8, %v1924_v9 }
0x1503   :  { %v2398_v16 = vpop.eup %2397 }
0x1504   :  { %v1925_v17 = vmul.f32 %v2398_v16, %v1909_v59  ;;  %v1936_v18 = vadd.f32 %v1935_v40, %v1930_v15 }
0x1506   :  { %v1931_v19 = vmul.f32 %v1929_v8, %v1925_v17  ;;  %1938 = vst.msk [vmem:[#allocation10] sm:$0xff] %vm130_vm1, %v1936_v18 }
0x1508   :  { %v1937_v23 = vadd.f32 %v1935_v40, %v1931_v19 }
0x150a   :  { %1939 = vst.msk [vmem:[#allocation10 + $0x8] sm:$0xff] %vm130_vm1, %v1937_v23 }
0x150b   :  { %2490 = shalt.err (!%p2487_p10)
}
0x150c   :  { %1951 = dma.vmem_to_hbm [thread:$0]  %s1946_s8, 256, %s3023_s9, [#allocation4], %s2509_s18, %s2509_s18, %s2510_s19  }
0x150d   :  { %2505 = dma.done.wait [#allocation4], 256  }
0x150e   :  { %2506 = vsyncadd [#allocation4], 4294967040 }
0x150f   :  { %1959 = vsyncpa [#allocation3], 1 }
0x1510   :  { %1960 = vsyncpa [#allocation6], 1 }
0x1511   :  { %1961 = vsyncpa [#allocation9], 1 }
0x1512   :  { %1962 = vsyncpa [#allocation4], 1 }

</bundles_post_ra>
